<compile_context>
chip_gen: v5e
topology: v5e:2x2
jax: 0.10.0
libtpu: 0.0.40
codegen_flags: <defaults>
</compile_context>

<pallas_src>
import math

import jax
import jax.numpy as jnp
from jax.experimental import pallas as pl
from jax.experimental.pallas import tpu as pltpu


def _round_up(x: int, m: int) -> int:
    return ((x + m - 1) // m) * m


# --------------------------------------------------------------------------
# Kernel: one LSTM timestep for one batch tile.  Invoked over grid (nb, T);
# the weights are resident, h/c are carried in VMEM scratch across T.
# --------------------------------------------------------------------------
def dplstm_seq_kernel(x_ref, wih_ref, whh_ref, b_ref, h0_ref, c0_ref,
                      hs_ref, c_last_ref, h_sc, c_sc):
    """
    x_ref      : [tile_b, in_pad]      x_t for this timestep (mm_dtype, padded)
    wih_ref    : [in_pad, 4*h_pad]     W_ih^T, gate-lane-padded  (resident)
    whh_ref    : [h_pad,  4*h_pad]     W_hh^T, gate-lane-padded  (resident)
    b_ref      : [1, 4*h_pad]          b_ih + b_hh, gate-padded  (resident)
    h0_ref     : [tile_b, h_pad]       initial hidden state (used at t == 0)
    c0_ref     : [tile_b, h_pad]       initial cell state   (used at t == 0)
    hs_ref     : [tile_b, h_pad]       h_t output for this timestep
    c_last_ref : [tile_b, h_pad] f32   final cell state (revisited over t)
    h_sc, c_sc : [tile_b, h_pad] f32   carried state across the T grid axis
    """
    t = pl.program_id(1)

    @pl.when(t == 0)
    def _():
        h_sc[...] = h0_ref[...].astype(jnp.float32)
        c_sc[...] = c0_ref[...].astype(jnp.float32)

    mm_dtype = wih_ref.dtype
    h_pad = h_sc.shape[-1]

    # Two MXU dots into one f32 accumulation (no wrapper-side [x|h] concat).
    gates = (
        jnp.dot(x_ref[...], wih_ref[...], preferred_element_type=jnp.float32)
        + jnp.dot(h_sc[...].astype(mm_dtype), whh_ref[...],
                  preferred_element_type=jnp.float32)
        + b_ref[...].astype(jnp.float32)
    )

    # sigmoid(v) = 0.5 * tanh(0.5 * v) + 0.5  -> one EUP transcendental.
    def sig(v):
        return 0.5 * jnp.tanh(0.5 * v) + 0.5

    # Lane-aligned gate slices (h_pad is a multiple of 128).
    i_t = sig(gates[:, 0 * h_pad:1 * h_pad])
    f_t = sig(gates[:, 1 * h_pad:2 * h_pad])
    g_t = jnp.tanh(gates[:, 2 * h_pad:3 * h_pad])
    o_t = sig(gates[:, 3 * h_pad:4 * h_pad])

    c_t = f_t * c_sc[...] + i_t * g_t
    h_t = o_t * jnp.tanh(c_t)

    h_sc[...] = h_t
    c_sc[...] = c_t
    hs_ref[...] = h_t.astype(hs_ref.dtype)
    c_last_ref[...] = c_t          # cell state kept at f32 precision


# --------------------------------------------------------------------------
# One-time parameter preparation (hoisted out of the per-step call).
# --------------------------------------------------------------------------
def prepare_dplstm_weights(w_ih, w_hh, b_ih=None, b_hh=None, *,
                           use_bf16_matmul=True):
    """Fuse / gate-pad / cast the DPLSTMCell parameters ONCE.

    w_ih: [4H, input_size], w_hh: [4H, hidden], b_*: [4H] (PyTorch layout).
    """
    four_h, input_size = w_ih.shape
    hidden = w_hh.shape[1]
    assert four_h == 4 * hidden and w_hh.shape[0] == 4 * hidden

    mm_dtype = jnp.bfloat16 if use_bf16_matmul else jnp.dtype(w_ih.dtype)
    in_pad = _round_up(input_size, 128)
    h_pad = _round_up(hidden, 128)

    def fuse(w, k, k_pad):
        # [4H, K] -> W^T [K, 4H] -> gate-pad so each gate slice starts on a
        # 128-lane boundary -> [K_pad, 4*h_pad]
        wt = w.T.reshape(k, 4, hidden)
        wt = jnp.pad(wt, ((0, k_pad - k), (0, 0), (0, h_pad - hidden)))
        return wt.reshape(k_pad, 4 * h_pad).astype(mm_dtype)

    if b_ih is None or b_hh is None:
        bias = jnp.zeros((1, 4 * h_pad), jnp.float32)
    else:
        bias = (b_ih + b_hh).reshape(4, hidden).astype(jnp.float32)
        bias = jnp.pad(bias, ((0, 0), (0, h_pad - hidden))).reshape(1, 4 * h_pad)

    return {
        "w_ih_t": fuse(w_ih, input_size, in_pad),
        "w_hh_t": fuse(w_hh, hidden, h_pad),
        "bias": bias,
        "input_size": input_size,
        "hidden": hidden,
        "in_pad": in_pad,
        "h_pad": h_pad,
        "mm_dtype": mm_dtype,
    }


def _pick_tile_b(batch: int, align: int) -> int:
    cap = 128  # v5e-friendly MXU M-dim / store slots; >=2 grid steps sooner.
    if batch > cap:
        return cap
    if batch >= 2 * align and batch % (2 * align) == 0:
        # Two tiles at zero padding cost -> "parallel" axis can use both TCs.
        return batch // 2
    return _round_up(max(batch, 1), align)


# --------------------------------------------------------------------------
# Sequence driver: T steps inside ONE pallas_call (weights DMA'd once).
# --------------------------------------------------------------------------
def dplstm_sequence(xs, h0, c0, prep):
    """xs: [T, B, input_size]; h0/c0: [B, hidden].

    Returns (hs [T, B, hidden] in xs.dtype, c_T [B, hidden] float32).
    """
    seq_len, batch, input_size = xs.shape
    hidden = prep["hidden"]
    in_pad, h_pad = prep["in_pad"], prep["h_pad"]
    mm_dtype = prep["mm_dtype"]
    assert input_size == prep["input_size"]
    assert h0.shape == (batch, hidden) and c0.shape == (batch, hidden)

    # bf16 packs 2 rows / sublane -> 16-row minimum tile; f32 -> 8.
    align = 16 if jnp.dtype(mm_dtype).itemsize == 2 else 8
    tile_b = _pick_tile_b(batch, align)
    b_pad = _round_up(batch, tile_b)
    nb = b_pad // tile_b

    # Streamed operand x_t: pad + cast to the MXU dtype in one wrapper pass.
    xs_p = jnp.pad(xs, ((0, 0), (0, b_pad - batch), (0, in_pad - input_size)))
    xs_p = xs_p.astype(mm_dtype)
    # Initial state: keep the caller's dtype for the DMA, cast in-kernel.
    h0_p = jnp.pad(h0, ((0, b_pad - batch), (0, h_pad - hidden)))
    c0_p = jnp.pad(c0, ((0, b_pad - batch), (0, h_pad - hidden)))

    out_h_dtype = xs.dtype

    # ---- explicit VMEM budget (with headroom), clamped for v7x -------------
    def isz(d):
        return jnp.dtype(d).itemsize

    total = (
        (in_pad + h_pad) * 4 * h_pad * isz(mm_dtype) * 2    # weights (worst case 2 bufs)
        + 4 * h_pad * 4 * 2                                  # bias
        + tile_b * in_pad * isz(mm_dtype) * 2                # x tile (double buffered)
        + 2 * 2 * tile_b * h_pad * isz(h0_p.dtype)           # h0/c0 tiles
        + tile_b * h_pad * isz(out_h_dtype) * 2              # hs out tile
        + tile_b * h_pad * 4 * 2                             # c_T out tile
        + 2 * tile_b * h_pad * 4                             # h/c scratch
        + tile_b * 4 * h_pad * 4 * 2                         # gates slab + temps
    )
    vmem_limit = int(min(64 * 2**20,                         # v7x physical / TC
                         max(32 * 2**20, 1.5 * total + (4 << 20))))

    # TODO(synk): for very large hidden sizes where even the bf16 weight does
    # not fit 64 MiB (v7x), add a K/gate tiling of the fused weight with an
    # f32 gate accumulator (pl.when init/finalize) instead of full residency.
    # TODO(synk): when the batch yields a single tile, additionally tile the
    # hidden/gate axis ("parallel") so both v7x TensorCores get work.

    def _call(single_buffer_weights):
        # Constant index_map => weights/bias are DMA'd once and stay resident;
        # Buffered(1) drops the pointless second buffer (halves their VMEM).
        wmode = ({"pipeline_mode": pl.Buffered(1)}
                 if single_buffer_weights else {})
        in_specs = [
            pl.BlockSpec((None, tile_b, in_pad), lambda b, t: (t, b, 0)),
            pl.BlockSpec((in_pad, 4 * h_pad), lambda b, t: (0, 0), **wmode),
            pl.BlockSpec((h_pad, 4 * h_pad), lambda b, t: (0, 0), **wmode),
            pl.BlockSpec((1, 4 * h_pad), lambda b, t: (0, 0), **wmode),
            pl.BlockSpec((tile_b, h_pad), lambda b, t: (b, 0)),
            pl.BlockSpec((tile_b, h_pad), lambda b, t: (b, 0)),
        ]
        out_specs = [
            pl.BlockSpec((None, tile_b, h_pad), lambda b, t: (t, b, 0)),
            pl.BlockSpec((tile_b, h_pad), lambda b, t: (b, 0)),
        ]
        return pl.pallas_call(
            dplstm_seq_kernel,
            out_shape=(
                jax.ShapeDtypeStruct((seq_len, b_pad, h_pad), out_h_dtype),
                jax.ShapeDtypeStruct((b_pad, h_pad), jnp.float32),
            ),
            grid_spec=pltpu.PrefetchScalarGridSpec(
                num_scalar_prefetch=0,
                grid=(nb, seq_len),                      # time axis last (sequential)
                in_specs=in_specs,
                out_specs=out_specs,
                scratch_shapes=[pltpu.VMEM((tile_b, h_pad), jnp.float32),
                                pltpu.VMEM((tile_b, h_pad), jnp.float32)],
            ),
            compiler_params=pltpu.CompilerParams(
                dimension_semantics=("parallel", "arbitrary"),
                vmem_limit_bytes=vmem_limit,
            ),
        )(xs_p, prep["w_ih_t"], prep["w_hh_t"], prep["bias"], h0_p, c0_p)

    try:
        hs_p, c_p = _call(True)
        jax.block_until_ready((hs_p, c_p))
    except Exception:
        # Portability fallback: jax without BlockSpec pipeline_mode support.
        hs_p, c_p = _call(False)

    hs = hs_p[:, :batch, :hidden]
    c_last = c_p[:batch, :hidden]
    return hs, c_last


# --------------------------------------------------------------------------
# DPLSTMCell.forward equivalent: one step.
# --------------------------------------------------------------------------
def dplstm_cell(x, h_prev, c_prev, w_ih, w_hh, b_ih=None, b_hh=None,
                batch_size_t=None, use_bf16_matmul=True, prep=None):
    """Matches DPLSTMCell.forward: one LSTM step -> (h_t, c_t).

    For repeated per-timestep calls, build `prep` once with
    prepare_dplstm_weights() — or better, use dplstm_sequence() so the whole
    time loop runs inside a single pallas_call with the weights resident.
    """
    if batch_size_t is not None:
        h_prev = h_prev[:batch_size_t, :]
        c_prev = c_prev[:batch_size_t, :]
    if prep is None:
        prep = prepare_dplstm_weights(w_ih, w_hh, b_ih, b_hh,
                                      use_bf16_matmul=use_bf16_matmul)
    hs, c_t = dplstm_sequence(x[None], h_prev, c_prev, prep)
    # c_t stays f32 (cell state is not downcast to the activation dtype).
    return hs[0], c_t


# --------------------------------------------------------------------------
# Pure-JAX references mirroring the PyTorch forward.
# --------------------------------------------------------------------------
def reference_cell(x, h_prev, c_prev, w_ih, w_hh, b_ih, b_hh):
    gates = x @ w_ih.T + b_ih + h_prev @ w_hh.T + b_hh
    hidden = h_prev.shape[-1]
    i_t = jax.nn.sigmoid(gates[:, 0 * hidden:1 * hidden])
    f_t = jax.nn.sigmoid(gates[:, 1 * hidden:2 * hidden])
    g_t = jnp.tanh(gates[:, 2 * hidden:3 * hidden])
    o_t = jax.nn.sigmoid(gates[:, 3 * hidden:4 * hidden])
    c_t = f_t * c_prev + i_t * g_t
    h_t = o_t * jnp.tanh(c_t)
    return h_t, c_t


def reference_sequence(xs, h0, c0, w_ih, w_hh, b_ih, b_hh):
    h, c = h0, c0
    hs = []
    for t in range(xs.shape[0]):
        h, c = reference_cell(xs[t], h, c, w_ih, w_hh, b_ih, b_hh)
        hs.append(h)
    return jnp.stack(hs, axis=0), c


if __name__ == "__main__":
    batch = 8
    input_size = 16
    hidden_size = 32
    seq_len = 6

    key = jax.random.PRNGKey(0)
    k_x, k_h, k_c, k_seq, k_wih, k_whh, k_bih, k_bhh = jax.random.split(key, 8)

    # reset_parameters(): uniform(-stdv, stdv) with stdv = 1/sqrt(hidden_size)
    stdv = 1.0 / math.sqrt(hidden_size)
    w_ih = jax.random.uniform(k_wih, (4 * hidden_size, input_size),
                              minval=-stdv, maxval=stdv, dtype=jnp.float32)
    w_hh = jax.random.uniform(k_whh, (4 * hidden_size, hidden_size),
                              minval=-stdv, maxval=stdv, dtype=jnp.float32)
    b_ih = jax.random.uniform(k_bih, (4 * hidden_size,),
                              minval=-stdv, maxval=stdv, dtype=jnp.float32)
    b_hh = jax.random.uniform(k_bhh, (4 * hidden_size,),
                              minval=-stdv, maxval=stdv, dtype=jnp.float32)

    x = jax.random.normal(k_x, (batch, input_size), dtype=jnp.float32)
    h_prev = jax.random.normal(k_h, (batch, hidden_size), dtype=jnp.float32)
    c_prev = jax.random.normal(k_c, (batch, hidden_size), dtype=jnp.float32)
    xs = jax.random.normal(k_seq, (seq_len, batch, input_size), dtype=jnp.float32)

    # Prepare (fuse/pad/cast) the weights ONCE — hoisted out of the per-step call.
    prep_f32 = prepare_dplstm_weights(w_ih, w_hh, b_ih, b_hh, use_bf16_matmul=False)
    prep_bf16 = prepare_dplstm_weights(w_ih, w_hh, b_ih, b_hh, use_bf16_matmul=True)

    h_ref, c_ref = reference_cell(x, h_prev, c_prev, w_ih, w_hh, b_ih, b_hh)

    # 1) Single step, exact-f32 MXU path.
    h1, c1 = dplstm_cell(x, h_prev, c_prev, w_ih, w_hh, b_ih, b_hh,
                         use_bf16_matmul=False, prep=prep_f32)
    jax.block_until_ready((h1, c1))
    assert h1.shape == (batch, hidden_size) and c1.shape == (batch, hidden_size)
    assert jnp.allclose(h1, h_ref, atol=1e-5, rtol=1e-5)
    assert jnp.allclose(c1, c_ref, atol=1e-5, rtol=1e-5)

    # 2) Single step, default bf16-MXU path (f32 accumulation + f32 gate math).
    h2, c2 = dplstm_cell(x, h_prev, c_prev, w_ih, w_hh, b_ih, b_hh, prep=prep_bf16)
    jax.block_until_ready((h2, c2))
    assert jnp.allclose(h2, h_ref, atol=5e-2, rtol=5e-2)
    assert jnp.allclose(c2, c_ref, atol=5e-2, rtol=5e-2)

    # 3) batch_size_t path (packed-sequence truncated batch).
    bt = 5
    h3, c3 = dplstm_cell(x[:bt], h_prev, c_prev, w_ih, w_hh, b_ih, b_hh,
                         batch_size_t=bt, use_bf16_matmul=False, prep=prep_f32)
    jax.block_until_ready((h3, c3))
    h_ref3, c_ref3 = reference_cell(x[:bt], h_prev[:bt], c_prev[:bt],
                                    w_ih, w_hh, b_ih, b_hh)
    assert h3.shape == (bt, hidden_size) and c3.shape == (bt, hidden_size)
    assert jnp.allclose(h3, h_ref3, atol=1e-5, rtol=1e-5)
    assert jnp.allclose(c3, c_ref3, atol=1e-5, rtol=1e-5)

    # 4) Whole sequence in ONE pallas_call (weights DMA'd once, h/c in VMEM).
    hs, c_T = dplstm_sequence(xs, h_prev, c_prev, prep_f32)
    jax.block_until_ready((hs, c_T))
    hs_ref, c_T_ref = reference_sequence(xs, h_prev, c_prev, w_ih, w_hh, b_ih, b_hh)
    assert hs.shape == (seq_len, batch, hidden_size)
    assert jnp.allclose(hs, hs_ref, atol=1e-4, rtol=1e-4)
    assert jnp.allclose(c_T, c_T_ref, atol=1e-4, rtol=1e-4)

    print("KERNEL_OK")
</pallas_src>

<mosaic_0001>
module attributes {stable_mosaic.version = 11 : i64} {
  func.func @dplstm_seq_kernel(%arg0: i32, %arg1: i32, %arg2: memref<1x8x128xf32, #tpu.memory_space<vmem>>, %arg3: memref<128x512xf32, #tpu.memory_space<vmem>>, %arg4: memref<128x512xf32, #tpu.memory_space<vmem>>, %arg5: memref<1x512xf32, #tpu.memory_space<vmem>>, %arg6: memref<8x128xf32, #tpu.memory_space<vmem>>, %arg7: memref<8x128xf32, #tpu.memory_space<vmem>>, %arg8: memref<1x8x128xf32, #tpu.memory_space<vmem>>, %arg9: memref<8x128xf32, #tpu.memory_space<vmem>>, %arg10: memref<8x128xf32, #tpu.memory_space<vmem>>, %arg11: memref<8x128xf32, #tpu.memory_space<vmem>>) attributes {dimension_semantics = [#tpu.dimension_semantics<parallel>, #tpu.dimension_semantics<arbitrary>], iteration_bounds = array<i64: 1, 1>, scalar_prefetch = 0 : i64, scratch_operands = 2 : i64, tpu.core_type = #tpu.core_type<tc>, window_params = [{transform_indices = @transform_0, window_bounds = array<i64: 1, 8, 128>}, {pipeline_mode = #tpu.pipeline_mode<synchronous>, transform_indices = @transform_1, window_bounds = array<i64: 128, 512>}, {pipeline_mode = #tpu.pipeline_mode<synchronous>, transform_indices = @transform_2, window_bounds = array<i64: 128, 512>}, {pipeline_mode = #tpu.pipeline_mode<synchronous>, transform_indices = @transform_3, window_bounds = array<i64: 1, 512>}, {transform_indices = @transform_4, window_bounds = array<i64: 8, 128>}, {transform_indices = @transform_5, window_bounds = array<i64: 8, 128>}, {transform_indices = @transform_6, window_bounds = array<i64: 1, 8, 128>}, {transform_indices = @transform_7, window_bounds = array<i64: 8, 128>}]} {
    %c0_i32 = arith.constant 0 : i32
    %0 = arith.cmpi eq, %arg1, %c0_i32 : i32
    %1 = arith.extui %0 : i1 to i32
    %c0_i32_0 = arith.constant 0 : i32
    %2 = arith.cmpi ne, %1, %c0_i32_0 : i32
    scf.if %2 {
      %c0_32 = arith.constant 0 : index
      %c0_33 = arith.constant 0 : index
      %52 = vector.load %arg6[%c0_32, %c0_33] : memref<8x128xf32, #tpu.memory_space<vmem>>, vector<8x128xf32>
      %c0_34 = arith.constant 0 : index
      %c0_35 = arith.constant 0 : index
      %53 = vector.load %arg10[%c0_34, %c0_35] : memref<8x128xf32, #tpu.memory_space<vmem>>, vector<8x128xf32>
      tpu.vector_store %arg10[%c0_34, %c0_35], %52 {strides = array<i32>} : memref<8x128xf32, #tpu.memory_space<vmem>>, vector<8x128xf32>,
      %c0_36 = arith.constant 0 : index
      %c0_37 = arith.constant 0 : index
      %54 = vector.load %arg7[%c0_36, %c0_37] : memref<8x128xf32, #tpu.memory_space<vmem>>, vector<8x128xf32>
      %c0_38 = arith.constant 0 : index
      %c0_39 = arith.constant 0 : index
      %55 = vector.load %arg11[%c0_38, %c0_39] : memref<8x128xf32, #tpu.memory_space<vmem>>, vector<8x128xf32>
      tpu.vector_store %arg11[%c0_38, %c0_39], %54 {strides = array<i32>} : memref<8x128xf32, #tpu.memory_space<vmem>>, vector<8x128xf32>,
    } else {
    }
    %c0 = arith.constant 0 : index
    %c0_1 = arith.constant 0 : index
    %c0_2 = arith.constant 0 : index
    %3 = vector.load %arg2[%c0, %c0_1, %c0_2] : memref<1x8x128xf32, #tpu.memory_space<vmem>>, vector<1x8x128xf32>
    %4 = vector.shape_cast %3 : vector<1x8x128xf32> to vector<8x128xf32>
    %c0_3 = arith.constant 0 : index
    %c0_4 = arith.constant 0 : index
    %5 = vector.load %arg3[%c0_3, %c0_4] : memref<128x512xf32, #tpu.memory_space<vmem>>, vector<128x512xf32>
    %cst = arith.constant dense<0.000000e+00> : vector<8x512xf32>
    %6 = tpu.matmul %4, %5, %cst {dimension_numbers = #tpu.dot_dimension_numbers<[1], [0], [0], [1], [0, 0, 1, 1], [], []>} : vector<8x128xf32>, vector<128x512xf32>, vector<8x512xf32> -> vector<8x512xf32>
    %c0_5 = arith.constant 0 : index
    %c0_6 = arith.constant 0 : index
    %7 = vector.load %arg10[%c0_5, %c0_6] : memref<8x128xf32, #tpu.memory_space<vmem>>, vector<8x128xf32>
    %c0_7 = arith.constant 0 : index
    %c0_8 = arith.constant 0 : index
    %8 = vector.load %arg4[%c0_7, %c0_8] : memref<128x512xf32, #tpu.memory_space<vmem>>, vector<128x512xf32>
    %cst_9 = arith.constant dense<0.000000e+00> : vector<8x512xf32>
    %9 = tpu.matmul %7, %8, %cst_9 {dimension_numbers = #tpu.dot_dimension_numbers<[1], [0], [0], [1], [0, 0, 1, 1], [], []>} : vector<8x128xf32>, vector<128x512xf32>, vector<8x512xf32> -> vector<8x512xf32>
    %10 = arith.addf %6, %9 : vector<8x512xf32>
    %c0_10 = arith.constant 0 : index
    %c0_11 = arith.constant 0 : index
    %11 = vector.load %arg5[%c0_10, %c0_11] : memref<1x512xf32, #tpu.memory_space<vmem>>, vector<1x512xf32>
    %12 = vector.broadcast %11 : vector<1x512xf32> to vector<8x512xf32>
    %13 = arith.addf %10, %12 : vector<8x512xf32>
    %14 = vector.extract_strided_slice %13 {offsets = [0, 0], sizes = [8, 128], strides = [1, 1]} : vector<8x512xf32> to vector<8x128xf32>
    %cst_12 = arith.constant 5.000000e-01 : f32
    %15 = vector.broadcast %cst_12 : f32 to vector<8x128xf32>
    %16 = arith.mulf %15, %14 : vector<8x128xf32>
    %17 = math.tanh %16 : vector<8x128xf32>
    %cst_13 = arith.constant 5.000000e-01 : f32
    %18 = vector.broadcast %cst_13 : f32 to vector<8x128xf32>
    %19 = arith.mulf %18, %17 : vector<8x128xf32>
    %cst_14 = arith.constant 5.000000e-01 : f32
    %20 = vector.broadcast %cst_14 : f32 to vector<8x128xf32>
    %21 = arith.addf %19, %20 : vector<8x128xf32>
    %22 = vector.extract_strided_slice %13 {offsets = [0, 128], sizes = [8, 128], strides = [1, 1]} : vector<8x512xf32> to vector<8x128xf32>
    %cst_15 = arith.constant 5.000000e-01 : f32
    %23 = vector.broadcast %cst_15 : f32 to vector<8x128xf32>
    %24 = arith.mulf %23, %22 : vector<8x128xf32>
    %25 = math.tanh %24 : vector<8x128xf32>
    %cst_16 = arith.constant 5.000000e-01 : f32
    %26 = vector.broadcast %cst_16 : f32 to vector<8x128xf32>
    %27 = arith.mulf %26, %25 : vector<8x128xf32>
    %cst_17 = arith.constant 5.000000e-01 : f32
    %28 = vector.broadcast %cst_17 : f32 to vector<8x128xf32>
    %29 = arith.addf %27, %28 : vector<8x128xf32>
    %30 = vector.extract_strided_slice %13 {offsets = [0, 256], sizes = [8, 128], strides = [1, 1]} : vector<8x512xf32> to vector<8x128xf32>
    %31 = math.tanh %30 : vector<8x128xf32>
    %32 = vector.extract_strided_slice %13 {offsets = [0, 384], sizes = [8, 128], strides = [1, 1]} : vector<8x512xf32> to vector<8x128xf32>
    %cst_18 = arith.constant 5.000000e-01 : f32
    %33 = vector.broadcast %cst_18 : f32 to vector<8x128xf32>
    %34 = arith.mulf %33, %32 : vector<8x128xf32>
    %35 = math.tanh %34 : vector<8x128xf32>
    %cst_19 = arith.constant 5.000000e-01 : f32
    %36 = vector.broadcast %cst_19 : f32 to vector<8x128xf32>
    %37 = arith.mulf %36, %35 : vector<8x128xf32>
    %cst_20 = arith.constant 5.000000e-01 : f32
    %38 = vector.broadcast %cst_20 : f32 to vector<8x128xf32>
    %39 = arith.addf %37, %38 : vector<8x128xf32>
    %c0_21 = arith.constant 0 : index
    %c0_22 = arith.constant 0 : index
    %40 = vector.load %arg11[%c0_21, %c0_22] : memref<8x128xf32, #tpu.memory_space<vmem>>, vector<8x128xf32>
    %41 = arith.mulf %29, %40 : vector<8x128xf32>
    %42 = arith.mulf %21, %31 : vector<8x128xf32>
    %43 = arith.addf %41, %42 : vector<8x128xf32>
    %44 = math.tanh %43 : vector<8x128xf32>
    %45 = arith.mulf %39, %44 : vector<8x128xf32>
    %c0_23 = arith.constant 0 : index
    %c0_24 = arith.constant 0 : index
    %46 = vector.load %arg10[%c0_23, %c0_24] : memref<8x128xf32, #tpu.memory_space<vmem>>, vector<8x128xf32>
    tpu.vector_store %arg10[%c0_23, %c0_24], %45 {strides = array<i32>} : memref<8x128xf32, #tpu.memory_space<vmem>>, vector<8x128xf32>,
    %c0_25 = arith.constant 0 : index
    %c0_26 = arith.constant 0 : index
    %47 = vector.load %arg11[%c0_25, %c0_26] : memref<8x128xf32, #tpu.memory_space<vmem>>, vector<8x128xf32>
    tpu.vector_store %arg11[%c0_25, %c0_26], %43 {strides = array<i32>} : memref<8x128xf32, #tpu.memory_space<vmem>>, vector<8x128xf32>,
    %c0_27 = arith.constant 0 : index
    %c0_28 = arith.constant 0 : index
    %c0_29 = arith.constant 0 : index
    %48 = vector.load %arg8[%c0_27, %c0_28, %c0_29] : memref<1x8x128xf32, #tpu.memory_space<vmem>>, vector<1x8x128xf32>
    %49 = vector.shape_cast %48 : vector<1x8x128xf32> to vector<8x128xf32>
    %50 = vector.shape_cast %45 : vector<8x128xf32> to vector<1x8x128xf32>
    tpu.vector_store %arg8[%c0_27, %c0_28, %c0_29], %50 {strides = array<i32>} : memref<1x8x128xf32, #tpu.memory_space<vmem>>, vector<1x8x128xf32>,
    %c0_30 = arith.constant 0 : index
    %c0_31 = arith.constant 0 : index
    %51 = vector.load %arg9[%c0_30, %c0_31] : memref<8x128xf32, #tpu.memory_space<vmem>>, vector<8x128xf32>
    tpu.vector_store %arg9[%c0_30, %c0_31], %43 {strides = array<i32>} : memref<8x128xf32, #tpu.memory_space<vmem>>, vector<8x128xf32>,
    return
  }
  func.func @transform_0(%arg0: i32, %arg1: i32) -> (i32, i32, i32) {
    %c0_i32 = arith.constant 0 : i32
    %c0_i32_0 = arith.constant 0 : i32
    return %arg1, %arg0, %c0_i32 : i32, i32, i32
  }
  func.func @transform_1(%arg0: i32, %arg1: i32) -> (i32, i32) {
    %c0_i32 = arith.constant 0 : i32
    %c0_i32_0 = arith.constant 0 : i32
    %c0_i32_1 = arith.constant 0 : i32
    return %c0_i32, %c0_i32_0 : i32, i32
  }
  func.func @transform_2(%arg0: i32, %arg1: i32) -> (i32, i32) {
    %c0_i32 = arith.constant 0 : i32
    %c0_i32_0 = arith.constant 0 : i32
    %c0_i32_1 = arith.constant 0 : i32
    return %c0_i32, %c0_i32_0 : i32, i32
  }
  func.func @transform_3(%arg0: i32, %arg1: i32) -> (i32, i32) {
    %c0_i32 = arith.constant 0 : i32
    %c0_i32_0 = arith.constant 0 : i32
    %c0_i32_1 = arith.constant 0 : i32
    return %c0_i32, %c0_i32_0 : i32, i32
  }
  func.func @transform_4(%arg0: i32, %arg1: i32) -> (i32, i32) {
    %c0_i32 = arith.constant 0 : i32
    %c0_i32_0 = arith.constant 0 : i32
    return %arg0, %c0_i32 : i32, i32
  }
  func.func @transform_5(%arg0: i32, %arg1: i32) -> (i32, i32) {
    %c0_i32 = arith.constant 0 : i32
    %c0_i32_0 = arith.constant 0 : i32
    return %arg0, %c0_i32 : i32, i32
  }
  func.func @transform_6(%arg0: i32, %arg1: i32) -> (i32, i32, i32) {
    %c0_i32 = arith.constant 0 : i32
    %c0_i32_0 = arith.constant 0 : i32
    return %arg1, %arg0, %c0_i32 : i32, i32, i32
  }
  func.func @transform_7(%arg0: i32, %arg1: i32) -> (i32, i32) {
    %c0_i32 = arith.constant 0 : i32
    %c0_i32_0 = arith.constant 0 : i32
    return %arg0, %c0_i32 : i32, i32
  }
}

module attributes {stable_mosaic.version = 11 : i64} {
  func.func @dplstm_seq_kernel(%arg0: i32, %arg1: i32, %arg2: memref<1x8x128xf32, #tpu.memory_space<vmem>>, %arg3: memref<128x512xf32, #tpu.memory_space<vmem>>, %arg4: memref<128x512xf32, #tpu.memory_space<vmem>>, %arg5: memref<1x512xf32, #tpu.memory_space<vmem>>, %arg6: memref<8x128xf32, #tpu.memory_space<vmem>>, %arg7: memref<8x128xf32, #tpu.memory_space<vmem>>, %arg8: memref<1x8x128xf32, #tpu.memory_space<vmem>>, %arg9: memref<8x128xf32, #tpu.memory_space<vmem>>, %arg10: memref<8x128xf32, #tpu.memory_space<vmem>>, %arg11: memref<8x128xf32, #tpu.memory_space<vmem>>) attributes {dimension_semantics = [#tpu.dimension_semantics<parallel>, #tpu.dimension_semantics<arbitrary>], iteration_bounds = array<i64: 1, 1>, scalar_prefetch = 0 : i64, scratch_operands = 2 : i64, tpu.core_type = #tpu.core_type<tc>, window_params = [{transform_indices = @transform_0, window_bounds = array<i64: 1, 8, 128>}, {pipeline_mode = #tpu.pipeline_mode<synchronous>, transform_indices = @transform_1, window_bounds = array<i64: 128, 512>}, {pipeline_mode = #tpu.pipeline_mode<synchronous>, transform_indices = @transform_2, window_bounds = array<i64: 128, 512>}, {pipeline_mode = #tpu.pipeline_mode<synchronous>, transform_indices = @transform_3, window_bounds = array<i64: 1, 512>}, {transform_indices = @transform_4, window_bounds = array<i64: 8, 128>}, {transform_indices = @transform_5, window_bounds = array<i64: 8, 128>}, {transform_indices = @transform_6, window_bounds = array<i64: 1, 8, 128>}, {transform_indices = @transform_7, window_bounds = array<i64: 8, 128>}]} {
    %c0_i32 = arith.constant 0 : i32
    %0 = arith.cmpi eq, %arg1, %c0_i32 : i32
    %1 = arith.extui %0 : i1 to i32
    %c0_i32_0 = arith.constant 0 : i32
    %2 = arith.cmpi ne, %1, %c0_i32_0 : i32
    scf.if %2 {
      %c0_32 = arith.constant 0 : index
      %c0_33 = arith.constant 0 : index
      %52 = vector.load %arg6[%c0_32, %c0_33] : memref<8x128xf32, #tpu.memory_space<vmem>>, vector<8x128xf32>
      %c0_34 = arith.constant 0 : index
      %c0_35 = arith.constant 0 : index
      %53 = vector.load %arg10[%c0_34, %c0_35] : memref<8x128xf32, #tpu.memory_space<vmem>>, vector<8x128xf32>
      tpu.vector_store %arg10[%c0_34, %c0_35], %52 {strides = array<i32>} : memref<8x128xf32, #tpu.memory_space<vmem>>, vector<8x128xf32>,
      %c0_36 = arith.constant 0 : index
      %c0_37 = arith.constant 0 : index
      %54 = vector.load %arg7[%c0_36, %c0_37] : memref<8x128xf32, #tpu.memory_space<vmem>>, vector<8x128xf32>
      %c0_38 = arith.constant 0 : index
      %c0_39 = arith.constant 0 : index
      %55 = vector.load %arg11[%c0_38, %c0_39] : memref<8x128xf32, #tpu.memory_space<vmem>>, vector<8x128xf32>
      tpu.vector_store %arg11[%c0_38, %c0_39], %54 {strides = array<i32>} : memref<8x128xf32, #tpu.memory_space<vmem>>, vector<8x128xf32>,
    } else {
    }
    %c0 = arith.constant 0 : index
    %c0_1 = arith.constant 0 : index
    %c0_2 = arith.constant 0 : index
    %3 = vector.load %arg2[%c0, %c0_1, %c0_2] : memref<1x8x128xf32, #tpu.memory_space<vmem>>, vector<1x8x128xf32>
    %4 = vector.shape_cast %3 : vector<1x8x128xf32> to vector<8x128xf32>
    %c0_3 = arith.constant 0 : index
    %c0_4 = arith.constant 0 : index
    %5 = vector.load %arg3[%c0_3, %c0_4] : memref<128x512xf32, #tpu.memory_space<vmem>>, vector<128x512xf32>
    %cst = arith.constant dense<0.000000e+00> : vector<8x512xf32>
    %6 = tpu.matmul %4, %5, %cst {dimension_numbers = #tpu.dot_dimension_numbers<[1], [0], [0], [1], [0, 0, 1, 1], [], []>} : vector<8x128xf32>, vector<128x512xf32>, vector<8x512xf32> -> vector<8x512xf32>
    %c0_5 = arith.constant 0 : index
    %c0_6 = arith.constant 0 : index
    %7 = vector.load %arg10[%c0_5, %c0_6] : memref<8x128xf32, #tpu.memory_space<vmem>>, vector<8x128xf32>
    %c0_7 = arith.constant 0 : index
    %c0_8 = arith.constant 0 : index
    %8 = vector.load %arg4[%c0_7, %c0_8] : memref<128x512xf32, #tpu.memory_space<vmem>>, vector<128x512xf32>
    %cst_9 = arith.constant dense<0.000000e+00> : vector<8x512xf32>
    %9 = tpu.matmul %7, %8, %cst_9 {dimension_numbers = #tpu.dot_dimension_numbers<[1], [0], [0], [1], [0, 0, 1, 1], [], []>} : vector<8x128xf32>, vector<128x512xf32>, vector<8x512xf32> -> vector<8x512xf32>
    %10 = arith.addf %6, %9 : vector<8x512xf32>
    %c0_10 = arith.constant 0 : index
    %c0_11 = arith.constant 0 : index
    %11 = vector.load %arg5[%c0_10, %c0_11] : memref<1x512xf32, #tpu.memory_space<vmem>>, vector<1x512xf32>
    %12 = vector.broadcast %11 : vector<1x512xf32> to vector<8x512xf32>
    %13 = arith.addf %10, %12 : vector<8x512xf32>
    %14 = vector.extract_strided_slice %13 {offsets = [0, 0], sizes = [8, 128], strides = [1, 1]} : vector<8x512xf32> to vector<8x128xf32>
    %cst_12 = arith.constant 5.000000e-01 : f32
    %15 = vector.broadcast %cst_12 : f32 to vector<8x128xf32>
    %16 = arith.mulf %15, %14 : vector<8x128xf32>
    %17 = math.tanh %16 : vector<8x128xf32>
    %cst_13 = arith.constant 5.000000e-01 : f32
    %18 = vector.broadcast %cst_13 : f32 to vector<8x128xf32>
    %19 = arith.mulf %18, %17 : vector<8x128xf32>
    %cst_14 = arith.constant 5.000000e-01 : f32
    %20 = vector.broadcast %cst_14 : f32 to vector<8x128xf32>
    %21 = arith.addf %19, %20 : vector<8x128xf32>
    %22 = vector.extract_strided_slice %13 {offsets = [0, 128], sizes = [8, 128], strides = [1, 1]} : vector<8x512xf32> to vector<8x128xf32>
    %cst_15 = arith.constant 5.000000e-01 : f32
    %23 = vector.broadcast %cst_15 : f32 to vector<8x128xf32>
    %24 = arith.mulf %23, %22 : vector<8x128xf32>
    %25 = math.tanh %24 : vector<8x128xf32>
    %cst_16 = arith.constant 5.000000e-01 : f32
    %26 = vector.broadcast %cst_16 : f32 to vector<8x128xf32>
    %27 = arith.mulf %26, %25 : vector<8x128xf32>
    %cst_17 = arith.constant 5.000000e-01 : f32
    %28 = vector.broadcast %cst_17 : f32 to vector<8x128xf32>
    %29 = arith.addf %27, %28 : vector<8x128xf32>
    %30 = vector.extract_strided_slice %13 {offsets = [0, 256], sizes = [8, 128], strides = [1, 1]} : vector<8x512xf32> to vector<8x128xf32>
    %31 = math.tanh %30 : vector<8x128xf32>
    %32 = vector.extract_strided_slice %13 {offsets = [0, 384], sizes = [8, 128], strides = [1, 1]} : vector<8x512xf32> to vector<8x128xf32>
    %cst_18 = arith.constant 5.000000e-01 : f32
    %33 = vector.broadcast %cst_18 : f32 to vector<8x128xf32>
    %34 = arith.mulf %33, %32 : vector<8x128xf32>
    %35 = math.tanh %34 : vector<8x128xf32>
    %cst_19 = arith.constant 5.000000e-01 : f32
    %36 = vector.broadcast %cst_19 : f32 to vector<8x128xf32>
    %37 = arith.mulf %36, %35 : vector<8x128xf32>
    %cst_20 = arith.constant 5.000000e-01 : f32
    %38 = vector.broadcast %cst_20 : f32 to vector<8x128xf32>
    %39 = arith.addf %37, %38 : vector<8x128xf32>
    %c0_21 = arith.constant 0 : index
    %c0_22 = arith.constant 0 : index
    %40 = vector.load %arg11[%c0_21, %c0_22] : memref<8x128xf32, #tpu.memory_space<vmem>>, vector<8x128xf32>
    %41 = arith.mulf %29, %40 : vector<8x128xf32>
    %42 = arith.mulf %21, %31 : vector<8x128xf32>
    %43 = arith.addf %41, %42 : vector<8x128xf32>
    %44 = math.tanh %43 : vector<8x128xf32>
    %45 = arith.mulf %39, %44 : vector<8x128xf32>
    %c0_23 = arith.constant 0 : index
    %c0_24 = arith.constant 0 : index
    %46 = vector.load %arg10[%c0_23, %c0_24] : memref<8x128xf32, #tpu.memory_space<vmem>>, vector<8x128xf32>
    tpu.vector_store %arg10[%c0_23, %c0_24], %45 {strides = array<i32>} : memref<8x128xf32, #tpu.memory_space<vmem>>, vector<8x128xf32>,
    %c0_25 = arith.constant 0 : index
    %c0_26 = arith.constant 0 : index
    %47 = vector.load %arg11[%c0_25, %c0_26] : memref<8x128xf32, #tpu.memory_space<vmem>>, vector<8x128xf32>
    tpu.vector_store %arg11[%c0_25, %c0_26], %43 {strides = array<i32>} : memref<8x128xf32, #tpu.memory_space<vmem>>, vector<8x128xf32>,
    %c0_27 = arith.constant 0 : index
    %c0_28 = arith.constant 0 : index
    %c0_29 = arith.constant 0 : index
    %48 = vector.load %arg8[%c0_27, %c0_28, %c0_29] : memref<1x8x128xf32, #tpu.memory_space<vmem>>, vector<1x8x128xf32>
    %49 = vector.shape_cast %48 : vector<1x8x128xf32> to vector<8x128xf32>
    %50 = vector.shape_cast %45 : vector<8x128xf32> to vector<1x8x128xf32>
    tpu.vector_store %arg8[%c0_27, %c0_28, %c0_29], %50 {strides = array<i32>} : memref<1x8x128xf32, #tpu.memory_space<vmem>>, vector<1x8x128xf32>,
    %c0_30 = arith.constant 0 : index
    %c0_31 = arith.constant 0 : index
    %51 = vector.load %arg9[%c0_30, %c0_31] : memref<8x128xf32, #tpu.memory_space<vmem>>, vector<8x128xf32>
    tpu.vector_store %arg9[%c0_30, %c0_31], %43 {strides = array<i32>} : memref<8x128xf32, #tpu.memory_space<vmem>>, vector<8x128xf32>,
    return
  }
  func.func @transform_0(%arg0: i32, %arg1: i32) -> (i32, i32, i32) {
    %c0_i32 = arith.constant 0 : i32
    %c0_i32_0 = arith.constant 0 : i32
    return %arg1, %arg0, %c0_i32 : i32, i32, i32
  }
  func.func @transform_1(%arg0: i32, %arg1: i32) -> (i32, i32) {
    %c0_i32 = arith.constant 0 : i32
    %c0_i32_0 = arith.constant 0 : i32
    %c0_i32_1 = arith.constant 0 : i32
    return %c0_i32, %c0_i32_0 : i32, i32
  }
  func.func @transform_2(%arg0: i32, %arg1: i32) -> (i32, i32) {
    %c0_i32 = arith.constant 0 : i32
    %c0_i32_0 = arith.constant 0 : i32
    %c0_i32_1 = arith.constant 0 : i32
    return %c0_i32, %c0_i32_0 : i32, i32
  }
  func.func @transform_3(%arg0: i32, %arg1: i32) -> (i32, i32) {
    %c0_i32 = arith.constant 0 : i32
    %c0_i32_0 = arith.constant 0 : i32
    %c0_i32_1 = arith.constant 0 : i32
    return %c0_i32, %c0_i32_0 : i32, i32
  }
  func.func @transform_4(%arg0: i32, %arg1: i32) -> (i32, i32) {
    %c0_i32 = arith.constant 0 : i32
    %c0_i32_0 = arith.constant 0 : i32
    return %arg0, %c0_i32 : i32, i32
  }
  func.func @transform_5(%arg0: i32, %arg1: i32) -> (i32, i32) {
    %c0_i32 = arith.constant 0 : i32
    %c0_i32_0 = arith.constant 0 : i32
    return %arg0, %c0_i32 : i32, i32
  }
  func.func @transform_6(%arg0: i32, %arg1: i32) -> (i32, i32, i32) {
    %c0_i32 = arith.constant 0 : i32
    %c0_i32_0 = arith.constant 0 : i32
    return %arg1, %arg0, %c0_i32 : i32, i32, i32
  }
  func.func @transform_7(%arg0: i32, %arg1: i32) -> (i32, i32) {
    %c0_i32 = arith.constant 0 : i32
    %c0_i32_0 = arith.constant 0 : i32
    return %arg0, %c0_i32 : i32, i32
  }
}

</mosaic_0001>

<bundles_post_ra>
// kernel: tpu_custom_call.1
= control target key start
LH: loop header
LB: loop body
LE: loop exit
PB: predicated region body
PF: predicated region fallthrough
CT: control target
= control target key end

     0   :  { %13 = vsyncpa [#allocation5], 0  ;;  %s782_s0 = inlined_call_operand.hbm [shape: f32[1,8,128], index: 0, kind: input, shape index: {}]   ;;  %s783_s1 = inlined_call_operand.hbm [shape: f32[128,512], index: 1, kind: input, shape index: {}]   ;;  %s784_s2 = inlined_call_operand.hbm [shape: f32[128,512], index: 2, kind: input, shape index: {}]   ;;  %s785_s3 = inlined_call_operand.hbm [shape: f32[1,512], index: 3, kind: input, shape index: {}]   ;;  %s786_s4 = inlined_call_operand.hbm [shape: f32[8,128], index: 4, kind: input, shape index: {}]   ;;  %s787_s5 = inlined_call_operand.hbm [shape: f32[8,128], index: 5, kind: input, shape index: {}]   ;;  %s788_s6 = inlined_call_operand.hbm [shape: f32[1,8,128], index: 6, kind: output, shape index: {0}]   ;;  %s789_s7 = inlined_call_operand.hbm [shape: f32[8,128], index: 7, kind: output, shape index: {1}]  }
   0x1   :  { %14 = vsyncpa [#allocation8], 0 }
   0x2   :  { %15 = vsyncpa [#allocation11], 0 }
   0x3   :  { %16 = vsyncpa [#allocation14], 0 }
   0x4   :  { %17 = vsyncpa [#allocation6], 0  ;;  %s34_s26 = sshll.u32 %s783_s1, 4  ;;  %s35_s26 = int_to_ptr.hbm [resolvable:$true] %s34_s26 }
   0x5   :  { %18 = vsyncpa [#allocation17], 0  ;;  %s708_s27 = smov [#allocation7]   ;;  %s61_s8 = sshll.u32 %s785_s3, 4  ;;  %s62_s8 = int_to_ptr.hbm [resolvable:$true] %s61_s8 }
   0x6   :  { %s36_s28 = sshll.u32 %s708_s27, 4  ;;  %s709_s9 = smov 512   ;;  %s37_s28 = int_to_ptr.vmem [resolvable:$true] %s36_s28 }
   0x7   :  { %s710_s10 = smov 32   ;;  %s711_s11 = smov [#allocation10]  }
   0x8   :  { %42 = dma.hbm_to_vmem [thread:$0]  %s35_s26, 8192, %s37_s28, [#allocation8], %s709_s9, %s709_s9, %s710_s10  }
   0x9   :  { %s63_s12 = sshll.u32 %s711_s11, 4  ;;  %s24_s15 = sshll.u32 %s782_s0, 4  ;;  %s64_s12 = int_to_ptr.vmem [resolvable:$true] %s63_s12  ;;  %s25_s15 = int_to_ptr.hbm [resolvable:$true] %s24_s15 }
   0xa   :  { %66 = dma.hbm_to_vmem [thread:$0]  %s62_s8, 64, %s64_s12, [#allocation11]  }
   0xb   :  { %s47_s17 = sshll.u32 %s784_s2, 4  ;;  %s712_s18 = smov [#allocation4]   ;;  %s48_s17 = int_to_ptr.hbm [resolvable:$true] %s47_s17 }
   0xc   :  { %s26_s19 = sshll.u32 %s712_s18, 4  ;;  %s713_s3 = smov [#allocation9]   ;;  %s27_s19 = int_to_ptr.vmem [resolvable:$true] %s26_s19 }
   0xd   :  { %29 = dma.hbm_to_vmem [thread:$0]  %s25_s15, 128, %s27_s19, [#allocation5]  }
   0xe   :  { %s49_s20 = sshll.u32 %s713_s3, 4  ;;  %s72_s23 = sshll.u32 %s786_s4, 4  ;;  %s50_s20 = int_to_ptr.vmem [resolvable:$true] %s49_s20  ;;  %s73_s23 = int_to_ptr.hbm [resolvable:$true] %s72_s23 }
   0xf   :  { %55 = dma.hbm_to_vmem [thread:$0]  %s48_s17, 8192, %s50_s20, [#allocation8], %s709_s9, %s709_s9, %s710_s10  }
  0x10   :  { %s83_s25 = sshll.u32 %s787_s5, 4  ;;  %s714_s26 = smov [#allocation12]   ;;  %s84_s25 = int_to_ptr.hbm [resolvable:$true] %s83_s25 }
  0x11   :  { %s74_s2 = sshll.u32 %s714_s26, 4  ;;  %s715_s27 = smov [#allocation13]   ;;  %s75_s2 = int_to_ptr.vmem [resolvable:$true] %s74_s2 }
  0x12   :  { %77 = dma.hbm_to_vmem [thread:$0]  %s73_s23, 128, %s75_s2, [#allocation11]  }
  0x13   :  { %s85_s28 = sshll.u32 %s715_s27, 4  ;;  %s86_s28 = int_to_ptr.vmem [resolvable:$true] %s85_s28 }
  0x14   :  { %88 = dma.hbm_to_vmem [thread:$0]  %s84_s25, 128, %s86_s28, [#allocation14]  }
  0x15   :  { %696 = dma.done.wait [#allocation5], 128  }
  0x16   :  { %697 = vsyncadd [#allocation5], 4294967168 }
  0x17   :  { %698 = dma.done.wait [#allocation8], 16384  }
  0x18   :  { %699 = vsyncadd [#allocation8], 4294950912 }
  0x19   :  { %700 = dma.done.wait [#allocation11], 192  }
  0x1a   :  { %701 = vsyncadd [#allocation11], 4294967104 }
  0x1b   :  { %702 = dma.done.wait [#allocation14], 128  }
  0x1c   :  { %703 = vsyncadd [#allocation14], 4294967168  ;;  %v247_v0 = vld [vmem:[#allocation9 + $0x1e0] sm:$0xff]  ;;  %v248_v1 = vld [vmem:[#allocation9 + $0x1e8] sm:$0xff]  ;;  %s716_s4 = smov [#allocation16]   ;;  %s466_s8 = sshll.u32 %s789_s7, 4  ;;  %s467_s8 = int_to_ptr.hbm [resolvable:$true] %s466_s8 }
  0x1d   :  { %v249_v2 = vld [vmem:[#allocation9 + $0x1f0] sm:$0xff]  ;;  %251 = vmatpush.msra.mxu0 %v247_v0  ;;  %271 = vmatpush.msra.mxu1 %v248_v1  ;;  %v250_v3 = vld [vmem:[#allocation9 + $0x1f8] sm:$0xff]  ;;  %v243_v4 = vld [vmem:[#allocation9 + $0x1c0] sm:$0xff]  ;;  %s464_s5 = sshll.u32 %s716_s4, 4  ;;  %s717_s9 = smov [#allocation15]   ;;  %s465_s5 = int_to_ptr.vmem [resolvable:$true] %s464_s5 }
  0x1e   :  { %v244_v5 = vld [vmem:[#allocation9 + $0x1c8] sm:$0xff]  ;;  %291 = vmatpush.msra.mxu2 %v249_v2  ;;  %311 = vmatpush.msra.mxu3 %v250_v3  ;;  %v245_v6 = vld [vmem:[#allocation9 + $0x1d0] sm:$0xff]  ;;  %v246_v7 = vld [vmem:[#allocation9 + $0x1d8] sm:$0xff]  ;;  %s453_s10 = sshll.u32 %s717_s9, 4  ;;  %s455_s13 = sshll.u32 %s788_s6, 4  ;;  %s454_s10 = int_to_ptr.vmem [resolvable:$true] %s453_s10  ;;  %s456_s13 = int_to_ptr.hbm [resolvable:$true] %s455_s13 }
  0x1f   :  { %v239_v8 = vld [vmem:[#allocation9 + $0x1a0] sm:$0xff]  ;;  %252 = vmatpush.msra.mxu0 %v243_v4  ;;  %272 = vmatpush.msra.mxu1 %v244_v5  ;;  %v240_v9 = vld [vmem:[#allocation9 + $0x1a8] sm:$0xff]  ;;  %v241_v10 = vld [vmem:[#allocation9 + $0x1b0] sm:$0xff] }
  0x20   :  { %v242_v11 = vld [vmem:[#allocation9 + $0x1b8] sm:$0xff]  ;;  %292 = vmatpush.msra.mxu2 %v245_v6  ;;  %312 = vmatpush.msra.mxu3 %v246_v7  ;;  %v235_v12 = vld [vmem:[#allocation9 + $0x180] sm:$0xff]  ;;  %v236_v13 = vld [vmem:[#allocation9 + $0x188] sm:$0xff] }
  0x21   :  { %253 = vmatpush.msra.mxu0 %v239_v8  ;;  %273 = vmatpush.msra.mxu1 %v240_v9  ;;  %v237_v14 = vld [vmem:[#allocation9 + $0x190] sm:$0xff]  ;;  %v238_v15 = vld [vmem:[#allocation9 + $0x198] sm:$0xff]  ;;  %v231_v16 = vld [vmem:[#allocation9 + $0x160] sm:$0xff] }
  0x22   :  { %293 = vmatpush.msra.mxu2 %v241_v10  ;;  %313 = vmatpush.msra.mxu3 %v242_v11  ;;  %v232_v17 = vld [vmem:[#allocation9 + $0x168] sm:$0xff]  ;;  %v233_v18 = vld [vmem:[#allocation9 + $0x170] sm:$0xff]  ;;  %v234_v19 = vld [vmem:[#allocation9 + $0x178] sm:$0xff] }
  0x23   :  { %254 = vmatpush.msra.mxu0 %v235_v12  ;;  %274 = vmatpush.msra.mxu1 %v236_v13  ;;  %v227_v20 = vld [vmem:[#allocation9 + $0x140] sm:$0xff]  ;;  %v228_v21 = vld [vmem:[#allocation9 + $0x148] sm:$0xff]  ;;  %v229_v22 = vld [vmem:[#allocation9 + $0x150] sm:$0xff] }
  0x24   :  { %294 = vmatpush.msra.mxu2 %v237_v14  ;;  %314 = vmatpush.msra.mxu3 %v238_v15  ;;  %v230_v23 = vld [vmem:[#allocation9 + $0x158] sm:$0xff]  ;;  %v223_v24 = vld [vmem:[#allocation9 + $0x120] sm:$0xff]  ;;  %v224_v25 = vld [vmem:[#allocation9 + $0x128] sm:$0xff] }
  0x25   :  { %255 = vmatpush.msra.mxu0 %v231_v16  ;;  %275 = vmatpush.msra.mxu1 %v232_v17  ;;  %v225_v26 = vld [vmem:[#allocation9 + $0x130] sm:$0xff]  ;;  %v226_v27 = vld [vmem:[#allocation9 + $0x138] sm:$0xff]  ;;  %v219_v28 = vld [vmem:[#allocation9 + $0x100] sm:$0xff] }
  0x26   :  { %295 = vmatpush.msra.mxu2 %v233_v18  ;;  %315 = vmatpush.msra.mxu3 %v234_v19  ;;  %v220_v29 = vld [vmem:[#allocation9 + $0x108] sm:$0xff]  ;;  %v221_v30 = vld [vmem:[#allocation9 + $0x110] sm:$0xff]  ;;  %v222_v31 = vld [vmem:[#allocation9 + $0x118] sm:$0xff] }
  0x27   :  { %256 = vmatpush.msra.mxu0 %v227_v20  ;;  %276 = vmatpush.msra.mxu1 %v228_v21  ;;  %v215_v32 = vld [vmem:[#allocation9 + $0xe0] sm:$0xff]  ;;  %v216_v33 = vld [vmem:[#allocation9 + $0xe8] sm:$0xff]  ;;  %v217_v34 = vld [vmem:[#allocation9 + $0xf0] sm:$0xff] }
  0x28   :  { %296 = vmatpush.msra.mxu2 %v229_v22  ;;  %316 = vmatpush.msra.mxu3 %v230_v23  ;;  %v218_v35 = vld [vmem:[#allocation9 + $0xf8] sm:$0xff]  ;;  %v211_v36 = vld [vmem:[#allocation9 + $0xc0] sm:$0xff]  ;;  %v212_v37 = vld [vmem:[#allocation9 + $0xc8] sm:$0xff] }
  0x29   :  { %257 = vmatpush.msra.mxu0 %v223_v24  ;;  %277 = vmatpush.msra.mxu1 %v224_v25  ;;  %v213_v38 = vld [vmem:[#allocation9 + $0xd0] sm:$0xff]  ;;  %v214_v39 = vld [vmem:[#allocation9 + $0xd8] sm:$0xff]  ;;  %v207_v40 = vld [vmem:[#allocation9 + $0xa0] sm:$0xff] }
  0x2a   :  { %297 = vmatpush.msra.mxu2 %v225_v26  ;;  %317 = vmatpush.msra.mxu3 %v226_v27  ;;  %v208_v41 = vld [vmem:[#allocation9 + $0xa8] sm:$0xff]  ;;  %v209_v42 = vld [vmem:[#allocation9 + $0xb0] sm:$0xff]  ;;  %v210_v43 = vld [vmem:[#allocation9 + $0xb8] sm:$0xff] }
  0x2b   :  { %258 = vmatpush.msra.mxu0 %v219_v28  ;;  %278 = vmatpush.msra.mxu1 %v220_v29  ;;  %v203_v44 = vld [vmem:[#allocation9 + $0x80] sm:$0xff]  ;;  %v204_v45 = vld [vmem:[#allocation9 + $0x88] sm:$0xff]  ;;  %v205_v46 = vld [vmem:[#allocation9 + $0x90] sm:$0xff] }
  0x2c   :  { %298 = vmatpush.msra.mxu2 %v221_v30  ;;  %318 = vmatpush.msra.mxu3 %v222_v31  ;;  %v206_v47 = vld [vmem:[#allocation9 + $0x98] sm:$0xff]  ;;  %v199_v48 = vld [vmem:[#allocation9 + $0x60] sm:$0xff]  ;;  %v200_v49 = vld [vmem:[#allocation9 + $0x68] sm:$0xff] }
  0x2d   :  { %259 = vmatpush.msra.mxu0 %v215_v32  ;;  %279 = vmatpush.msra.mxu1 %v216_v33  ;;  %v201_v50 = vld [vmem:[#allocation9 + $0x70] sm:$0xff]  ;;  %v202_v51 = vld [vmem:[#allocation9 + $0x78] sm:$0xff]  ;;  %v195_v52 = vld [vmem:[#allocation9 + $0x40] sm:$0xff] }
  0x2e   :  { %299 = vmatpush.msra.mxu2 %v217_v34  ;;  %319 = vmatpush.msra.mxu3 %v218_v35  ;;  %v196_v53 = vld [vmem:[#allocation9 + $0x48] sm:$0xff]  ;;  %v197_v54 = vld [vmem:[#allocation9 + $0x50] sm:$0xff]  ;;  %v198_v55 = vld [vmem:[#allocation9 + $0x58] sm:$0xff] }
  0x2f   :  { %260 = vmatpush.msra.mxu0 %v211_v36  ;;  %280 = vmatpush.msra.mxu1 %v212_v37  ;;  %v191_v56 = vld [vmem:[#allocation9 + $0x20] sm:$0xff]  ;;  %v192_v57 = vld [vmem:[#allocation9 + $0x28] sm:$0xff]  ;;  %v193_v58 = vld [vmem:[#allocation9 + $0x30] sm:$0xff] }
  0x30   :  { %300 = vmatpush.msra.mxu2 %v213_v38  ;;  %320 = vmatpush.msra.mxu3 %v214_v39  ;;  %v194_v59 = vld [vmem:[#allocation9 + $0x38] sm:$0xff]  ;;  %v187_v60 = vld [vmem:[#allocation9] sm:$0xff]  ;;  %v188_v61 = vld [vmem:[#allocation9 + $0x8] sm:$0xff] }
  0x31   :  { %261 = vmatpush.msra.mxu0 %v207_v40  ;;  %281 = vmatpush.msra.mxu1 %v208_v41  ;;  %v189_v62 = vld [vmem:[#allocation9 + $0x10] sm:$0xff]  ;;  %v190_v63 = vld [vmem:[#allocation9 + $0x18] sm:$0xff]  ;;  %v182_v0 = vld [vmem:[#allocation7 + $0x1e0] sm:$0xff] }
  0x32   :  { %301 = vmatpush.msra.mxu2 %v209_v42  ;;  %321 = vmatpush.msra.mxu3 %v210_v43  ;;  %v183_v1 = vld [vmem:[#allocation7 + $0x1e8] sm:$0xff]  ;;  %v184_v2 = vld [vmem:[#allocation7 + $0x1f0] sm:$0xff]  ;;  %v185_v3 = vld [vmem:[#allocation7 + $0x1f8] sm:$0xff] }
  0x33   :  { %262 = vmatpush.msra.mxu0 %v203_v44  ;;  %282 = vmatpush.msra.mxu1 %v204_v45  ;;  %v178_v4 = vld [vmem:[#allocation7 + $0x1c0] sm:$0xff]  ;;  %v179_v5 = vld [vmem:[#allocation7 + $0x1c8] sm:$0xff]  ;;  %v180_v6 = vld [vmem:[#allocation7 + $0x1d0] sm:$0xff] }
  0x34   :  { %302 = vmatpush.msra.mxu2 %v205_v46  ;;  %322 = vmatpush.msra.mxu3 %v206_v47  ;;  %v181_v7 = vld [vmem:[#allocation7 + $0x1d8] sm:$0xff]  ;;  %v174_v8 = vld [vmem:[#allocation7 + $0x1a0] sm:$0xff]  ;;  %v175_v9 = vld [vmem:[#allocation7 + $0x1a8] sm:$0xff] }
  0x35   :  { %263 = vmatpush.msra.mxu0 %v199_v48  ;;  %283 = vmatpush.msra.mxu1 %v200_v49  ;;  %v176_v10 = vld [vmem:[#allocation7 + $0x1b0] sm:$0xff]  ;;  %v177_v11 = vld [vmem:[#allocation7 + $0x1b8] sm:$0xff]  ;;  %v170_v12 = vld [vmem:[#allocation7 + $0x180] sm:$0xff] }
  0x36   :  { %303 = vmatpush.msra.mxu2 %v201_v50  ;;  %323 = vmatpush.msra.mxu3 %v202_v51  ;;  %v171_v13 = vld [vmem:[#allocation7 + $0x188] sm:$0xff]  ;;  %v172_v14 = vld [vmem:[#allocation7 + $0x190] sm:$0xff]  ;;  %v173_v15 = vld [vmem:[#allocation7 + $0x198] sm:$0xff] }
  0x37   :  { %264 = vmatpush.msra.mxu0 %v195_v52  ;;  %284 = vmatpush.msra.mxu1 %v196_v53  ;;  %v166_v16 = vld [vmem:[#allocation7 + $0x160] sm:$0xff]  ;;  %v167_v17 = vld [vmem:[#allocation7 + $0x168] sm:$0xff]  ;;  %v168_v18 = vld [vmem:[#allocation7 + $0x170] sm:$0xff] }
  0x38   :  { %304 = vmatpush.msra.mxu2 %v197_v54  ;;  %324 = vmatpush.msra.mxu3 %v198_v55  ;;  %v169_v19 = vld [vmem:[#allocation7 + $0x178] sm:$0xff]  ;;  %v162_v20 = vld [vmem:[#allocation7 + $0x140] sm:$0xff]  ;;  %v163_v21 = vld [vmem:[#allocation7 + $0x148] sm:$0xff] }
  0x39   :  { %265 = vmatpush.msra.mxu0 %v191_v56  ;;  %285 = vmatpush.msra.mxu1 %v192_v57  ;;  %v164_v22 = vld [vmem:[#allocation7 + $0x150] sm:$0xff]  ;;  %v165_v23 = vld [vmem:[#allocation7 + $0x158] sm:$0xff]  ;;  %v158_v24 = vld [vmem:[#allocation7 + $0x120] sm:$0xff] }
  0x3a   :  { %305 = vmatpush.msra.mxu2 %v193_v58  ;;  %325 = vmatpush.msra.mxu3 %v194_v59  ;;  %v159_v25 = vld [vmem:[#allocation7 + $0x128] sm:$0xff]  ;;  %v160_v26 = vld [vmem:[#allocation7 + $0x130] sm:$0xff]  ;;  %v161_v27 = vld [vmem:[#allocation7 + $0x138] sm:$0xff] }
  0x3b   :  { %266 = vmatpush.msra.mxu0 %v187_v60  ;;  %286 = vmatpush.msra.mxu1 %v188_v61  ;;  %v154_v28 = vld [vmem:[#allocation7 + $0x100] sm:$0xff]  ;;  %v155_v29 = vld [vmem:[#allocation7 + $0x108] sm:$0xff]  ;;  %v156_v30 = vld [vmem:[#allocation7 + $0x110] sm:$0xff] }
  0x3c   :  { %306 = vmatpush.msra.mxu2 %v189_v62  ;;  %326 = vmatpush.msra.mxu3 %v190_v63  ;;  %v157_v31 = vld [vmem:[#allocation7 + $0x118] sm:$0xff]  ;;  %v150_v32 = vld [vmem:[#allocation7 + $0xe0] sm:$0xff]  ;;  %v151_v33 = vld [vmem:[#allocation7 + $0xe8] sm:$0xff] }
  0x3d   :  { %331 = vmatpush.msrb.mxu0 %v182_v0  ;;  %351 = vmatpush.msrb.mxu1 %v183_v1  ;;  %v152_v34 = vld [vmem:[#allocation7 + $0xf0] sm:$0xff]  ;;  %v153_v35 = vld [vmem:[#allocation7 + $0xf8] sm:$0xff]  ;;  %v146_v36 = vld [vmem:[#allocation7 + $0xc0] sm:$0xff] }
  0x3e   :  { %371 = vmatpush.msrb.mxu2 %v184_v2  ;;  %391 = vmatpush.msrb.mxu3 %v185_v3  ;;  %v147_v37 = vld [vmem:[#allocation7 + $0xc8] sm:$0xff]  ;;  %v148_v38 = vld [vmem:[#allocation7 + $0xd0] sm:$0xff]  ;;  %v149_v39 = vld [vmem:[#allocation7 + $0xd8] sm:$0xff] }
  0x3f   :  { %332 = vmatpush.msrb.mxu0 %v178_v4  ;;  %352 = vmatpush.msrb.mxu1 %v179_v5  ;;  %v142_v40 = vld [vmem:[#allocation7 + $0xa0] sm:$0xff]  ;;  %v143_v41 = vld [vmem:[#allocation7 + $0xa8] sm:$0xff]  ;;  %v144_v42 = vld [vmem:[#allocation7 + $0xb0] sm:$0xff] }
  0x40   :  { %372 = vmatpush.msrb.mxu2 %v180_v6  ;;  %392 = vmatpush.msrb.mxu3 %v181_v7  ;;  %v145_v43 = vld [vmem:[#allocation7 + $0xb8] sm:$0xff]  ;;  %v138_v44 = vld [vmem:[#allocation7 + $0x80] sm:$0xff]  ;;  %v139_v45 = vld [vmem:[#allocation7 + $0x88] sm:$0xff] }
  0x41   :  { %333 = vmatpush.msrb.mxu0 %v174_v8  ;;  %353 = vmatpush.msrb.mxu1 %v175_v9  ;;  %v140_v46 = vld [vmem:[#allocation7 + $0x90] sm:$0xff]  ;;  %v141_v47 = vld [vmem:[#allocation7 + $0x98] sm:$0xff]  ;;  %v117_v48 = vld [vmem:[#allocation12] sm:$0xff] }
  0x42   :  { %373 = vmatpush.msrb.mxu2 %v176_v10  ;;  %393 = vmatpush.msrb.mxu3 %v177_v11  ;;  %v134_v49 = vld [vmem:[#allocation7 + $0x60] sm:$0xff]  ;;  %v135_v50 = vld [vmem:[#allocation7 + $0x68] sm:$0xff]  ;;  %v136_v51 = vld [vmem:[#allocation7 + $0x70] sm:$0xff] }
  0x43   :  { %334 = vmatpush.msrb.mxu0 %v170_v12  ;;  %354 = vmatpush.msrb.mxu1 %v171_v13  ;;  %v137_v52 = vld [vmem:[#allocation7 + $0x78] sm:$0xff]  ;;  %v130_v53 = vld [vmem:[#allocation7 + $0x40] sm:$0xff]  ;;  %v131_v54 = vld [vmem:[#allocation7 + $0x48] sm:$0xff] }
  0x44   :  { %374 = vmatpush.msrb.mxu2 %v172_v14  ;;  %394 = vmatpush.msrb.mxu3 %v173_v15  ;;  %v132_v55 = vld [vmem:[#allocation7 + $0x50] sm:$0xff]  ;;  %v133_v56 = vld [vmem:[#allocation7 + $0x58] sm:$0xff]  ;;  %v126_v57 = vld [vmem:[#allocation7 + $0x20] sm:$0xff] }
  0x45   :  { %335 = vmatpush.msrb.mxu0 %v166_v16  ;;  %355 = vmatpush.msrb.mxu1 %v167_v17  ;;  %v127_v58 = vld [vmem:[#allocation7 + $0x28] sm:$0xff]  ;;  %v128_v59 = vld [vmem:[#allocation7 + $0x30] sm:$0xff]  ;;  %v129_v60 = vld [vmem:[#allocation7 + $0x38] sm:$0xff] }
  0x46   :  { %375 = vmatpush.msrb.mxu2 %v168_v18  ;;  %395 = vmatpush.msrb.mxu3 %v169_v19  ;;  %v122_v61 = vld [vmem:[#allocation7] sm:$0xff]  ;;  %v123_v62 = vld [vmem:[#allocation7 + $0x8] sm:$0xff]  ;;  %v124_v63 = vld [vmem:[#allocation7 + $0x10] sm:$0xff] }
  0x47   :  { %336 = vmatpush.msrb.mxu0 %v162_v20  ;;  %356 = vmatpush.msrb.mxu1 %v163_v21  ;;  %v125_v0 = vld [vmem:[#allocation7 + $0x18] sm:$0xff]  ;;  %v411_v4 = vld [vmem:[#allocation10] sm:$0xf] }
  0x48   :  { %376 = vmatpush.msrb.mxu2 %v164_v22  ;;  %396 = vmatpush.msrb.mxu3 %v165_v23  ;;  %v121_v1 = vld [vmem:[#allocation4] sm:$0xff]  ;;  %v413_v7 = vperm.slane %v411_v4, 0  ;;  %v414_v8 = vperm.slane %v411_v4, 1  ;;  %v415_v17 = vperm.slane %v411_v4, 2  ;;  %v416_v18 = vperm.slane %v411_v4, 3 }
  0x49   :  { %337 = vmatpush.msrb.mxu0 %v158_v24  ;;  %357 = vmatpush.msrb.mxu1 %v159_v25 }
  0x4a   :  { %377 = vmatpush.msrb.mxu2 %v160_v26  ;;  %397 = vmatpush.msrb.mxu3 %v161_v27 }
  0x4b   :  { %338 = vmatpush.msrb.mxu0 %v154_v28  ;;  %358 = vmatpush.msrb.mxu1 %v155_v29 }
  0x4c   :  { %378 = vmatpush.msrb.mxu2 %v156_v30  ;;  %398 = vmatpush.msrb.mxu3 %v157_v31  ;;  %v119_v31 = vld [vmem:[#allocation13] sm:$0xff] }
  0x4d   :  { %339 = vmatpush.msrb.mxu0 %v150_v32  ;;  %359 = vmatpush.msrb.mxu1 %v151_v33 }
  0x4e   :  { %379 = vmatpush.msrb.mxu2 %v152_v34  ;;  %399 = vmatpush.msrb.mxu3 %v153_v35 }
  0x4f   :  { %340 = vmatpush.msrb.mxu0 %v146_v36  ;;  %360 = vmatpush.msrb.mxu1 %v147_v37 }
  0x50   :  { %380 = vmatpush.msrb.mxu2 %v148_v38  ;;  %400 = vmatpush.msrb.mxu3 %v149_v39 }
  0x51   :  { %341 = vmatpush.msrb.mxu0 %v142_v40  ;;  %361 = vmatpush.msrb.mxu1 %v143_v41 }
  0x52   :  { %381 = vmatpush.msrb.mxu2 %v144_v42  ;;  %401 = vmatpush.msrb.mxu3 %v145_v43 }
  0x53   :  { %342 = vmatpush.msrb.mxu0 %v138_v44  ;;  %362 = vmatpush.msrb.mxu1 %v139_v45 }
  0x54   :  { %382 = vmatpush.msrb.mxu2 %v140_v46  ;;  %402 = vmatpush.msrb.mxu3 %v141_v47 }
  0x55   :  { %267 = vmatmul.f32.vlgmr.msra.gmra.mxu0 %v117_v48  ;;  %287 = vmatmul.f32.vlgmr.msra.gmra.mxu1 %v117_v48 }
  0x56   :  { %307 = vmatmul.f32.vlgmr.msra.gmra.mxu2 %v117_v48  ;;  %327 = vmatmul.f32.vlgmr.msra.gmra.mxu3 %v117_v48 }
  0x57   :  { %343 = vmatpush.msrb.mxu0 %v134_v49  ;;  %363 = vmatpush.msrb.mxu1 %v135_v50 }
  0x58   :  { %383 = vmatpush.msrb.mxu2 %v136_v51  ;;  %403 = vmatpush.msrb.mxu3 %v137_v52 }
  0x59   :  { %344 = vmatpush.msrb.mxu0 %v130_v53  ;;  %364 = vmatpush.msrb.mxu1 %v131_v54 }
  0x5a   :  { %384 = vmatpush.msrb.mxu2 %v132_v55  ;;  %404 = vmatpush.msrb.mxu3 %v133_v56 }
  0x5b   :  { %345 = vmatpush.msrb.mxu0 %v126_v57  ;;  %365 = vmatpush.msrb.mxu1 %v127_v58 }
  0x5c   :  { %385 = vmatpush.msrb.mxu2 %v128_v59  ;;  %405 = vmatpush.msrb.mxu3 %v129_v60 }
  0x5d   :  { %346 = vmatpush.msrb.mxu0 %v122_v61  ;;  %366 = vmatpush.msrb.mxu1 %v123_v62 }
  0x5e   :  { %386 = vmatpush.msrb.mxu2 %v124_v63  ;;  %406 = vmatpush.msrb.mxu3 %v125_v0 }
  0x5f   :  { %347 = vmatmul.f32.vlgmr.msrb.gmra.mxu0 %v121_v1  ;;  %367 = vmatmul.f32.vlgmr.msrb.gmra.mxu1 %v121_v1 }
  0x60   :  { %387 = vmatmul.f32.vlgmr.msrb.gmra.mxu2 %v121_v1  ;;  %407 = vmatmul.f32.vlgmr.msrb.gmra.mxu3 %v121_v1 }
  0xd2   :  { %v268_v2 = vpop.f32.mrf.mxu0  ;;  %v288_v3 = vpop.f32.mrf.mxu1 }
  0xd9   :  { %v308_v5 = vpop.f32.mrf.mxu2  ;;  %v328_v6 = vpop.f32.mrf.mxu3 }
  0xdc   :  { %v348_v9 = vpop.f32.mrf.mxu0  ;;  %v368_v10 = vpop.f32.mrf.mxu1 }
  0xdd   :  { %v349_v11 = vadd.f32 %v348_v9, %v268_v2  ;;  %v369_v12 = vadd.f32 %v368_v10, %v288_v3 }
  0xdf   :  { %v421_v13 = vadd.f32 %v413_v7, %v349_v11  ;;  %v422_v14 = vadd.f32 %v414_v8, %v369_v12 }
  0xe1   :  { %v425_v15 = vmul.f32 0.5, %v421_v13  ;;  %v429_v16 = vmul.f32 0.5, %v422_v14 }
  0xe3   :  { %494 = vtanh.f32 %v425_v15  ;;  %v388_v19 = vpop.f32.mrf.mxu2  ;;  %v408_v20 = vpop.f32.mrf.mxu3 }
  0xe4   :  { %496 = vtanh.f32 %v429_v16  ;;  %v389_v21 = vadd.f32 %v388_v19, %v308_v5  ;;  %v409_v22 = vadd.f32 %v408_v20, %v328_v6 }
  0xe6   :  { %v423_v23 = vadd.f32 %v415_v17, %v389_v21  ;;  %v424_v24 = vadd.f32 %v416_v18, %v409_v22 }
  0xe8   :  { %498 = vtanh.f32 %v423_v23  ;;  %v434_v25 = vmul.f32 0.5, %v424_v24 }
  0xe9   :  { %v495_v26 = vpop.eup %494 }
  0xea   :  { %v497_v27 = vpop.eup %496  ;;  %v427_v28 = vmul.f32 0.5, %v495_v26  ;;  %500 = vtanh.f32 %v434_v25 }
  0xeb   :  { %v431_v29 = vmul.f32 0.5, %v497_v27 }
  0xec   :  { %v428_v30 = vadd.f32 0.5, %v427_v28 }
  0xed   :  { %v432_v32 = vadd.f32 0.5, %v431_v29 }
  0xee   :  { %v499_v33 = vpop.eup %498 }
  0xef   :  { %v439_v34 = vmul.f32 %v432_v32, %v119_v31  ;;  %v440_v35 = vmul.f32 %v499_v33, %v428_v30 }
  0xf0   :  { %v501_v36 = vpop.eup %500 }
  0xf1   :  { %v441_v37 = vadd.f32 %v440_v35, %v439_v34  ;;  %v436_v38 = vmul.f32 0.5, %v501_v36 }
  0xf3   :  { %447 = vst [vmem:[#allocation16] sm:$0xff] %v441_v37  ;;  %502 = vtanh.f32 %v441_v37  ;;  %v437_v39 = vadd.f32 0.5, %v436_v38 }
  0xf4   :  { %469 = dma.vmem_to_hbm [thread:$0]  %s465_s5, 128, %s467_s8, [#allocation17]  }
  0xf9   :  { %v503_v40 = vpop.eup %502 }
  0xfa   :  { %v443_v41 = vmul.f32 %v503_v40, %v437_v39 }
  0xfc   :  { %446 = vst [vmem:[#allocation15] sm:$0xff] %v443_v41 }
  0xfd   :  { %458 = dma.vmem_to_hbm [thread:$0]  %s454_s10, 128, %s456_s13, [#allocation6]  }
  0xfe   :  { %704 = dma.done.wait [#allocation6], 128  }
  0xff   :  { %705 = vsyncadd [#allocation6], 4294967168 }
 0x100   :  { %706 = dma.done.wait [#allocation17], 128  }
 0x101   :  { %707 = vsyncadd [#allocation17], 4294967168 }
 0x102   :  { %478 = vsyncpa [#allocation5], 1 }
 0x103   :  { %479 = vsyncpa [#allocation8], 1 }
 0x104   :  { %480 = vsyncpa [#allocation11], 1 }
 0x105   :  { %481 = vsyncpa [#allocation14], 1 }
 0x106   :  { %482 = vsyncpa [#allocation6], 1 }
 0x107   :  { %483 = vsyncpa [#allocation17], 1 }

// kernel: tpu_custom_call.1
= control target key start
LH: loop header
LB: loop body
LE: loop exit
PB: predicated region body
PF: predicated region fallthrough
CT: control target
= control target key end

     0   :  { %13 = vsyncpa [#allocation5], 0  ;;  %s782_s0 = inlined_call_operand.hbm [shape: f32[1,8,128], index: 0, kind: input, shape index: {}]   ;;  %s783_s1 = inlined_call_operand.hbm [shape: f32[128,512], index: 1, kind: input, shape index: {}]   ;;  %s784_s2 = inlined_call_operand.hbm [shape: f32[128,512], index: 2, kind: input, shape index: {}]   ;;  %s785_s3 = inlined_call_operand.hbm [shape: f32[1,512], index: 3, kind: input, shape index: {}]   ;;  %s786_s4 = inlined_call_operand.hbm [shape: f32[8,128], index: 4, kind: input, shape index: {}]   ;;  %s787_s5 = inlined_call_operand.hbm [shape: f32[8,128], index: 5, kind: input, shape index: {}]   ;;  %s788_s6 = inlined_call_operand.hbm [shape: f32[1,8,128], index: 6, kind: output, shape index: {0}]   ;;  %s789_s7 = inlined_call_operand.hbm [shape: f32[8,128], index: 7, kind: output, shape index: {1}]  }
   0x1   :  { %14 = vsyncpa [#allocation8], 0 }
   0x2   :  { %15 = vsyncpa [#allocation11], 0 }
   0x3   :  { %16 = vsyncpa [#allocation14], 0 }
   0x4   :  { %17 = vsyncpa [#allocation6], 0  ;;  %s34_s26 = sshll.u32 %s783_s1, 4  ;;  %s35_s26 = int_to_ptr.hbm [resolvable:$true] %s34_s26 }
   0x5   :  { %18 = vsyncpa [#allocation17], 0  ;;  %s708_s27 = smov [#allocation7]   ;;  %s61_s8 = sshll.u32 %s785_s3, 4  ;;  %s62_s8 = int_to_ptr.hbm [resolvable:$true] %s61_s8 }
   0x6   :  { %s36_s28 = sshll.u32 %s708_s27, 4  ;;  %s709_s9 = smov 512   ;;  %s37_s28 = int_to_ptr.vmem [resolvable:$true] %s36_s28 }
   0x7   :  { %s710_s10 = smov 32   ;;  %s711_s11 = smov [#allocation10]  }
   0x8   :  { %42 = dma.hbm_to_vmem [thread:$0]  %s35_s26, 8192, %s37_s28, [#allocation8], %s709_s9, %s709_s9, %s710_s10  }
   0x9   :  { %s63_s12 = sshll.u32 %s711_s11, 4  ;;  %s24_s15 = sshll.u32 %s782_s0, 4  ;;  %s64_s12 = int_to_ptr.vmem [resolvable:$true] %s63_s12  ;;  %s25_s15 = int_to_ptr.hbm [resolvable:$true] %s24_s15 }
   0xa   :  { %66 = dma.hbm_to_vmem [thread:$0]  %s62_s8, 64, %s64_s12, [#allocation11]  }
   0xb   :  { %s47_s17 = sshll.u32 %s784_s2, 4  ;;  %s712_s18 = smov [#allocation4]   ;;  %s48_s17 = int_to_ptr.hbm [resolvable:$true] %s47_s17 }
   0xc   :  { %s26_s19 = sshll.u32 %s712_s18, 4  ;;  %s713_s3 = smov [#allocation9]   ;;  %s27_s19 = int_to_ptr.vmem [resolvable:$true] %s26_s19 }
   0xd   :  { %29 = dma.hbm_to_vmem [thread:$0]  %s25_s15, 128, %s27_s19, [#allocation5]  }
   0xe   :  { %s49_s20 = sshll.u32 %s713_s3, 4  ;;  %s72_s23 = sshll.u32 %s786_s4, 4  ;;  %s50_s20 = int_to_ptr.vmem [resolvable:$true] %s49_s20  ;;  %s73_s23 = int_to_ptr.hbm [resolvable:$true] %s72_s23 }
   0xf   :  { %55 = dma.hbm_to_vmem [thread:$0]  %s48_s17, 8192, %s50_s20, [#allocation8], %s709_s9, %s709_s9, %s710_s10  }
  0x10   :  { %s83_s25 = sshll.u32 %s787_s5, 4  ;;  %s714_s26 = smov [#allocation12]   ;;  %s84_s25 = int_to_ptr.hbm [resolvable:$true] %s83_s25 }
  0x11   :  { %s74_s2 = sshll.u32 %s714_s26, 4  ;;  %s715_s27 = smov [#allocation13]   ;;  %s75_s2 = int_to_ptr.vmem [resolvable:$true] %s74_s2 }
  0x12   :  { %77 = dma.hbm_to_vmem [thread:$0]  %s73_s23, 128, %s75_s2, [#allocation11]  }
  0x13   :  { %s85_s28 = sshll.u32 %s715_s27, 4  ;;  %s86_s28 = int_to_ptr.vmem [resolvable:$true] %s85_s28 }
  0x14   :  { %88 = dma.hbm_to_vmem [thread:$0]  %s84_s25, 128, %s86_s28, [#allocation14]  }
  0x15   :  { %696 = dma.done.wait [#allocation5], 128  }
  0x16   :  { %697 = vsyncadd [#allocation5], 4294967168 }
  0x17   :  { %698 = dma.done.wait [#allocation8], 16384  }
  0x18   :  { %699 = vsyncadd [#allocation8], 4294950912 }
  0x19   :  { %700 = dma.done.wait [#allocation11], 192  }
  0x1a   :  { %701 = vsyncadd [#allocation11], 4294967104 }
  0x1b   :  { %702 = dma.done.wait [#allocation14], 128  }
  0x1c   :  { %703 = vsyncadd [#allocation14], 4294967168  ;;  %v247_v0 = vld [vmem:[#allocation9 + $0x1e0] sm:$0xff]  ;;  %v248_v1 = vld [vmem:[#allocation9 + $0x1e8] sm:$0xff]  ;;  %s716_s4 = smov [#allocation16]   ;;  %s466_s8 = sshll.u32 %s789_s7, 4  ;;  %s467_s8 = int_to_ptr.hbm [resolvable:$true] %s466_s8 }
  0x1d   :  { %v249_v2 = vld [vmem:[#allocation9 + $0x1f0] sm:$0xff]  ;;  %251 = vmatpush.msra.mxu0 %v247_v0  ;;  %271 = vmatpush.msra.mxu1 %v248_v1  ;;  %v250_v3 = vld [vmem:[#allocation9 + $0x1f8] sm:$0xff]  ;;  %v243_v4 = vld [vmem:[#allocation9 + $0x1c0] sm:$0xff]  ;;  %s464_s5 = sshll.u32 %s716_s4, 4  ;;  %s717_s9 = smov [#allocation15]   ;;  %s465_s5 = int_to_ptr.vmem [resolvable:$true] %s464_s5 }
  0x1e   :  { %v244_v5 = vld [vmem:[#allocation9 + $0x1c8] sm:$0xff]  ;;  %291 = vmatpush.msra.mxu2 %v249_v2  ;;  %311 = vmatpush.msra.mxu3 %v250_v3  ;;  %v245_v6 = vld [vmem:[#allocation9 + $0x1d0] sm:$0xff]  ;;  %v246_v7 = vld [vmem:[#allocation9 + $0x1d8] sm:$0xff]  ;;  %s453_s10 = sshll.u32 %s717_s9, 4  ;;  %s455_s13 = sshll.u32 %s788_s6, 4  ;;  %s454_s10 = int_to_ptr.vmem [resolvable:$true] %s453_s10  ;;  %s456_s13 = int_to_ptr.hbm [resolvable:$true] %s455_s13 }
  0x1f   :  { %v239_v8 = vld [vmem:[#allocation9 + $0x1a0] sm:$0xff]  ;;  %252 = vmatpush.msra.mxu0 %v243_v4  ;;  %272 = vmatpush.msra.mxu1 %v244_v5  ;;  %v240_v9 = vld [vmem:[#allocation9 + $0x1a8] sm:$0xff]  ;;  %v241_v10 = vld [vmem:[#allocation9 + $0x1b0] sm:$0xff] }
  0x20   :  { %v242_v11 = vld [vmem:[#allocation9 + $0x1b8] sm:$0xff]  ;;  %292 = vmatpush.msra.mxu2 %v245_v6  ;;  %312 = vmatpush.msra.mxu3 %v246_v7  ;;  %v235_v12 = vld [vmem:[#allocation9 + $0x180] sm:$0xff]  ;;  %v236_v13 = vld [vmem:[#allocation9 + $0x188] sm:$0xff] }
  0x21   :  { %253 = vmatpush.msra.mxu0 %v239_v8  ;;  %273 = vmatpush.msra.mxu1 %v240_v9  ;;  %v237_v14 = vld [vmem:[#allocation9 + $0x190] sm:$0xff]  ;;  %v238_v15 = vld [vmem:[#allocation9 + $0x198] sm:$0xff]  ;;  %v231_v16 = vld [vmem:[#allocation9 + $0x160] sm:$0xff] }
  0x22   :  { %293 = vmatpush.msra.mxu2 %v241_v10  ;;  %313 = vmatpush.msra.mxu3 %v242_v11  ;;  %v232_v17 = vld [vmem:[#allocation9 + $0x168] sm:$0xff]  ;;  %v233_v18 = vld [vmem:[#allocation9 + $0x170] sm:$0xff]  ;;  %v234_v19 = vld [vmem:[#allocation9 + $0x178] sm:$0xff] }
  0x23   :  { %254 = vmatpush.msra.mxu0 %v235_v12  ;;  %274 = vmatpush.msra.mxu1 %v236_v13  ;;  %v227_v20 = vld [vmem:[#allocation9 + $0x140] sm:$0xff]  ;;  %v228_v21 = vld [vmem:[#allocation9 + $0x148] sm:$0xff]  ;;  %v229_v22 = vld [vmem:[#allocation9 + $0x150] sm:$0xff] }
  0x24   :  { %294 = vmatpush.msra.mxu2 %v237_v14  ;;  %314 = vmatpush.msra.mxu3 %v238_v15  ;;  %v230_v23 = vld [vmem:[#allocation9 + $0x158] sm:$0xff]  ;;  %v223_v24 = vld [vmem:[#allocation9 + $0x120] sm:$0xff]  ;;  %v224_v25 = vld [vmem:[#allocation9 + $0x128] sm:$0xff] }
  0x25   :  { %255 = vmatpush.msra.mxu0 %v231_v16  ;;  %275 = vmatpush.msra.mxu1 %v232_v17  ;;  %v225_v26 = vld [vmem:[#allocation9 + $0x130] sm:$0xff]  ;;  %v226_v27 = vld [vmem:[#allocation9 + $0x138] sm:$0xff]  ;;  %v219_v28 = vld [vmem:[#allocation9 + $0x100] sm:$0xff] }
  0x26   :  { %295 = vmatpush.msra.mxu2 %v233_v18  ;;  %315 = vmatpush.msra.mxu3 %v234_v19  ;;  %v220_v29 = vld [vmem:[#allocation9 + $0x108] sm:$0xff]  ;;  %v221_v30 = vld [vmem:[#allocation9 + $0x110] sm:$0xff]  ;;  %v222_v31 = vld [vmem:[#allocation9 + $0x118] sm:$0xff] }
  0x27   :  { %256 = vmatpush.msra.mxu0 %v227_v20  ;;  %276 = vmatpush.msra.mxu1 %v228_v21  ;;  %v215_v32 = vld [vmem:[#allocation9 + $0xe0] sm:$0xff]  ;;  %v216_v33 = vld [vmem:[#allocation9 + $0xe8] sm:$0xff]  ;;  %v217_v34 = vld [vmem:[#allocation9 + $0xf0] sm:$0xff] }
  0x28   :  { %296 = vmatpush.msra.mxu2 %v229_v22  ;;  %316 = vmatpush.msra.mxu3 %v230_v23  ;;  %v218_v35 = vld [vmem:[#allocation9 + $0xf8] sm:$0xff]  ;;  %v211_v36 = vld [vmem:[#allocation9 + $0xc0] sm:$0xff]  ;;  %v212_v37 = vld [vmem:[#allocation9 + $0xc8] sm:$0xff] }
  0x29   :  { %257 = vmatpush.msra.mxu0 %v223_v24  ;;  %277 = vmatpush.msra.mxu1 %v224_v25  ;;  %v213_v38 = vld [vmem:[#allocation9 + $0xd0] sm:$0xff]  ;;  %v214_v39 = vld [vmem:[#allocation9 + $0xd8] sm:$0xff]  ;;  %v207_v40 = vld [vmem:[#allocation9 + $0xa0] sm:$0xff] }
  0x2a   :  { %297 = vmatpush.msra.mxu2 %v225_v26  ;;  %317 = vmatpush.msra.mxu3 %v226_v27  ;;  %v208_v41 = vld [vmem:[#allocation9 + $0xa8] sm:$0xff]  ;;  %v209_v42 = vld [vmem:[#allocation9 + $0xb0] sm:$0xff]  ;;  %v210_v43 = vld [vmem:[#allocation9 + $0xb8] sm:$0xff] }
  0x2b   :  { %258 = vmatpush.msra.mxu0 %v219_v28  ;;  %278 = vmatpush.msra.mxu1 %v220_v29  ;;  %v203_v44 = vld [vmem:[#allocation9 + $0x80] sm:$0xff]  ;;  %v204_v45 = vld [vmem:[#allocation9 + $0x88] sm:$0xff]  ;;  %v205_v46 = vld [vmem:[#allocation9 + $0x90] sm:$0xff] }
  0x2c   :  { %298 = vmatpush.msra.mxu2 %v221_v30  ;;  %318 = vmatpush.msra.mxu3 %v222_v31  ;;  %v206_v47 = vld [vmem:[#allocation9 + $0x98] sm:$0xff]  ;;  %v199_v48 = vld [vmem:[#allocation9 + $0x60] sm:$0xff]  ;;  %v200_v49 = vld [vmem:[#allocation9 + $0x68] sm:$0xff] }
  0x2d   :  { %259 = vmatpush.msra.mxu0 %v215_v32  ;;  %279 = vmatpush.msra.mxu1 %v216_v33  ;;  %v201_v50 = vld [vmem:[#allocation9 + $0x70] sm:$0xff]  ;;  %v202_v51 = vld [vmem:[#allocation9 + $0x78] sm:$0xff]  ;;  %v195_v52 = vld [vmem:[#allocation9 + $0x40] sm:$0xff] }
  0x2e   :  { %299 = vmatpush.msra.mxu2 %v217_v34  ;;  %319 = vmatpush.msra.mxu3 %v218_v35  ;;  %v196_v53 = vld [vmem:[#allocation9 + $0x48] sm:$0xff]  ;;  %v197_v54 = vld [vmem:[#allocation9 + $0x50] sm:$0xff]  ;;  %v198_v55 = vld [vmem:[#allocation9 + $0x58] sm:$0xff] }
  0x2f   :  { %260 = vmatpush.msra.mxu0 %v211_v36  ;;  %280 = vmatpush.msra.mxu1 %v212_v37  ;;  %v191_v56 = vld [vmem:[#allocation9 + $0x20] sm:$0xff]  ;;  %v192_v57 = vld [vmem:[#allocation9 + $0x28] sm:$0xff]  ;;  %v193_v58 = vld [vmem:[#allocation9 + $0x30] sm:$0xff] }
  0x30   :  { %300 = vmatpush.msra.mxu2 %v213_v38  ;;  %320 = vmatpush.msra.mxu3 %v214_v39  ;;  %v194_v59 = vld [vmem:[#allocation9 + $0x38] sm:$0xff]  ;;  %v187_v60 = vld [vmem:[#allocation9] sm:$0xff]  ;;  %v188_v61 = vld [vmem:[#allocation9 + $0x8] sm:$0xff] }
  0x31   :  { %261 = vmatpush.msra.mxu0 %v207_v40  ;;  %281 = vmatpush.msra.mxu1 %v208_v41  ;;  %v189_v62 = vld [vmem:[#allocation9 + $0x10] sm:$0xff]  ;;  %v190_v63 = vld [vmem:[#allocation9 + $0x18] sm:$0xff]  ;;  %v182_v0 = vld [vmem:[#allocation7 + $0x1e0] sm:$0xff] }
  0x32   :  { %301 = vmatpush.msra.mxu2 %v209_v42  ;;  %321 = vmatpush.msra.mxu3 %v210_v43  ;;  %v183_v1 = vld [vmem:[#allocation7 + $0x1e8] sm:$0xff]  ;;  %v184_v2 = vld [vmem:[#allocation7 + $0x1f0] sm:$0xff]  ;;  %v185_v3 = vld [vmem:[#allocation7 + $0x1f8] sm:$0xff] }
  0x33   :  { %262 = vmatpush.msra.mxu0 %v203_v44  ;;  %282 = vmatpush.msra.mxu1 %v204_v45  ;;  %v178_v4 = vld [vmem:[#allocation7 + $0x1c0] sm:$0xff]  ;;  %v179_v5 = vld [vmem:[#allocation7 + $0x1c8] sm:$0xff]  ;;  %v180_v6 = vld [vmem:[#allocation7 + $0x1d0] sm:$0xff] }
  0x34   :  { %302 = vmatpush.msra.mxu2 %v205_v46  ;;  %322 = vmatpush.msra.mxu3 %v206_v47  ;;  %v181_v7 = vld [vmem:[#allocation7 + $0x1d8] sm:$0xff]  ;;  %v174_v8 = vld [vmem:[#allocation7 + $0x1a0] sm:$0xff]  ;;  %v175_v9 = vld [vmem:[#allocation7 + $0x1a8] sm:$0xff] }
  0x35   :  { %263 = vmatpush.msra.mxu0 %v199_v48  ;;  %283 = vmatpush.msra.mxu1 %v200_v49  ;;  %v176_v10 = vld [vmem:[#allocation7 + $0x1b0] sm:$0xff]  ;;  %v177_v11 = vld [vmem:[#allocation7 + $0x1b8] sm:$0xff]  ;;  %v170_v12 = vld [vmem:[#allocation7 + $0x180] sm:$0xff] }
  0x36   :  { %303 = vmatpush.msra.mxu2 %v201_v50  ;;  %323 = vmatpush.msra.mxu3 %v202_v51  ;;  %v171_v13 = vld [vmem:[#allocation7 + $0x188] sm:$0xff]  ;;  %v172_v14 = vld [vmem:[#allocation7 + $0x190] sm:$0xff]  ;;  %v173_v15 = vld [vmem:[#allocation7 + $0x198] sm:$0xff] }
  0x37   :  { %264 = vmatpush.msra.mxu0 %v195_v52  ;;  %284 = vmatpush.msra.mxu1 %v196_v53  ;;  %v166_v16 = vld [vmem:[#allocation7 + $0x160] sm:$0xff]  ;;  %v167_v17 = vld [vmem:[#allocation7 + $0x168] sm:$0xff]  ;;  %v168_v18 = vld [vmem:[#allocation7 + $0x170] sm:$0xff] }
  0x38   :  { %304 = vmatpush.msra.mxu2 %v197_v54  ;;  %324 = vmatpush.msra.mxu3 %v198_v55  ;;  %v169_v19 = vld [vmem:[#allocation7 + $0x178] sm:$0xff]  ;;  %v162_v20 = vld [vmem:[#allocation7 + $0x140] sm:$0xff]  ;;  %v163_v21 = vld [vmem:[#allocation7 + $0x148] sm:$0xff] }
  0x39   :  { %265 = vmatpush.msra.mxu0 %v191_v56  ;;  %285 = vmatpush.msra.mxu1 %v192_v57  ;;  %v164_v22 = vld [vmem:[#allocation7 + $0x150] sm:$0xff]  ;;  %v165_v23 = vld [vmem:[#allocation7 + $0x158] sm:$0xff]  ;;  %v158_v24 = vld [vmem:[#allocation7 + $0x120] sm:$0xff] }
  0x3a   :  { %305 = vmatpush.msra.mxu2 %v193_v58  ;;  %325 = vmatpush.msra.mxu3 %v194_v59  ;;  %v159_v25 = vld [vmem:[#allocation7 + $0x128] sm:$0xff]  ;;  %v160_v26 = vld [vmem:[#allocation7 + $0x130] sm:$0xff]  ;;  %v161_v27 = vld [vmem:[#allocation7 + $0x138] sm:$0xff] }
  0x3b   :  { %266 = vmatpush.msra.mxu0 %v187_v60  ;;  %286 = vmatpush.msra.mxu1 %v188_v61  ;;  %v154_v28 = vld [vmem:[#allocation7 + $0x100] sm:$0xff]  ;;  %v155_v29 = vld [vmem:[#allocation7 + $0x108] sm:$0xff]  ;;  %v156_v30 = vld [vmem:[#allocation7 + $0x110] sm:$0xff] }
  0x3c   :  { %306 = vmatpush.msra.mxu2 %v189_v62  ;;  %326 = vmatpush.msra.mxu3 %v190_v63  ;;  %v157_v31 = vld [vmem:[#allocation7 + $0x118] sm:$0xff]  ;;  %v150_v32 = vld [vmem:[#allocation7 + $0xe0] sm:$0xff]  ;;  %v151_v33 = vld [vmem:[#allocation7 + $0xe8] sm:$0xff] }
  0x3d   :  { %331 = vmatpush.msrb.mxu0 %v182_v0  ;;  %351 = vmatpush.msrb.mxu1 %v183_v1  ;;  %v152_v34 = vld [vmem:[#allocation7 + $0xf0] sm:$0xff]  ;;  %v153_v35 = vld [vmem:[#allocation7 + $0xf8] sm:$0xff]  ;;  %v146_v36 = vld [vmem:[#allocation7 + $0xc0] sm:$0xff] }
  0x3e   :  { %371 = vmatpush.msrb.mxu2 %v184_v2  ;;  %391 = vmatpush.msrb.mxu3 %v185_v3  ;;  %v147_v37 = vld [vmem:[#allocation7 + $0xc8] sm:$0xff]  ;;  %v148_v38 = vld [vmem:[#allocation7 + $0xd0] sm:$0xff]  ;;  %v149_v39 = vld [vmem:[#allocation7 + $0xd8] sm:$0xff] }
  0x3f   :  { %332 = vmatpush.msrb.mxu0 %v178_v4  ;;  %352 = vmatpush.msrb.mxu1 %v179_v5  ;;  %v142_v40 = vld [vmem:[#allocation7 + $0xa0] sm:$0xff]  ;;  %v143_v41 = vld [vmem:[#allocation7 + $0xa8] sm:$0xff]  ;;  %v144_v42 = vld [vmem:[#allocation7 + $0xb0] sm:$0xff] }
  0x40   :  { %372 = vmatpush.msrb.mxu2 %v180_v6  ;;  %392 = vmatpush.msrb.mxu3 %v181_v7  ;;  %v145_v43 = vld [vmem:[#allocation7 + $0xb8] sm:$0xff]  ;;  %v138_v44 = vld [vmem:[#allocation7 + $0x80] sm:$0xff]  ;;  %v139_v45 = vld [vmem:[#allocation7 + $0x88] sm:$0xff] }
  0x41   :  { %333 = vmatpush.msrb.mxu0 %v174_v8  ;;  %353 = vmatpush.msrb.mxu1 %v175_v9  ;;  %v140_v46 = vld [vmem:[#allocation7 + $0x90] sm:$0xff]  ;;  %v141_v47 = vld [vmem:[#allocation7 + $0x98] sm:$0xff]  ;;  %v117_v48 = vld [vmem:[#allocation12] sm:$0xff] }
  0x42   :  { %373 = vmatpush.msrb.mxu2 %v176_v10  ;;  %393 = vmatpush.msrb.mxu3 %v177_v11  ;;  %v134_v49 = vld [vmem:[#allocation7 + $0x60] sm:$0xff]  ;;  %v135_v50 = vld [vmem:[#allocation7 + $0x68] sm:$0xff]  ;;  %v136_v51 = vld [vmem:[#allocation7 + $0x70] sm:$0xff] }
  0x43   :  { %334 = vmatpush.msrb.mxu0 %v170_v12  ;;  %354 = vmatpush.msrb.mxu1 %v171_v13  ;;  %v137_v52 = vld [vmem:[#allocation7 + $0x78] sm:$0xff]  ;;  %v130_v53 = vld [vmem:[#allocation7 + $0x40] sm:$0xff]  ;;  %v131_v54 = vld [vmem:[#allocation7 + $0x48] sm:$0xff] }
  0x44   :  { %374 = vmatpush.msrb.mxu2 %v172_v14  ;;  %394 = vmatpush.msrb.mxu3 %v173_v15  ;;  %v132_v55 = vld [vmem:[#allocation7 + $0x50] sm:$0xff]  ;;  %v133_v56 = vld [vmem:[#allocation7 + $0x58] sm:$0xff]  ;;  %v126_v57 = vld [vmem:[#allocation7 + $0x20] sm:$0xff] }
  0x45   :  { %335 = vmatpush.msrb.mxu0 %v166_v16  ;;  %355 = vmatpush.msrb.mxu1 %v167_v17  ;;  %v127_v58 = vld [vmem:[#allocation7 + $0x28] sm:$0xff]  ;;  %v128_v59 = vld [vmem:[#allocation7 + $0x30] sm:$0xff]  ;;  %v129_v60 = vld [vmem:[#allocation7 + $0x38] sm:$0xff] }
  0x46   :  { %375 = vmatpush.msrb.mxu2 %v168_v18  ;;  %395 = vmatpush.msrb.mxu3 %v169_v19  ;;  %v122_v61 = vld [vmem:[#allocation7] sm:$0xff]  ;;  %v123_v62 = vld [vmem:[#allocation7 + $0x8] sm:$0xff]  ;;  %v124_v63 = vld [vmem:[#allocation7 + $0x10] sm:$0xff] }
  0x47   :  { %336 = vmatpush.msrb.mxu0 %v162_v20  ;;  %356 = vmatpush.msrb.mxu1 %v163_v21  ;;  %v125_v0 = vld [vmem:[#allocation7 + $0x18] sm:$0xff]  ;;  %v411_v4 = vld [vmem:[#allocation10] sm:$0xf] }
  0x48   :  { %376 = vmatpush.msrb.mxu2 %v164_v22  ;;  %396 = vmatpush.msrb.mxu3 %v165_v23  ;;  %v121_v1 = vld [vmem:[#allocation4] sm:$0xff]  ;;  %v413_v7 = vperm.slane %v411_v4, 0  ;;  %v414_v8 = vperm.slane %v411_v4, 1  ;;  %v415_v17 = vperm.slane %v411_v4, 2  ;;  %v416_v18 = vperm.slane %v411_v4, 3 }
  0x49   :  { %337 = vmatpush.msrb.mxu0 %v158_v24  ;;  %357 = vmatpush.msrb.mxu1 %v159_v25 }
  0x4a   :  { %377 = vmatpush.msrb.mxu2 %v160_v26  ;;  %397 = vmatpush.msrb.mxu3 %v161_v27 }
  0x4b   :  { %338 = vmatpush.msrb.mxu0 %v154_v28  ;;  %358 = vmatpush.msrb.mxu1 %v155_v29 }
  0x4c   :  { %378 = vmatpush.msrb.mxu2 %v156_v30  ;;  %398 = vmatpush.msrb.mxu3 %v157_v31  ;;  %v119_v31 = vld [vmem:[#allocation13] sm:$0xff] }
  0x4d   :  { %339 = vmatpush.msrb.mxu0 %v150_v32  ;;  %359 = vmatpush.msrb.mxu1 %v151_v33 }
  0x4e   :  { %379 = vmatpush.msrb.mxu2 %v152_v34  ;;  %399 = vmatpush.msrb.mxu3 %v153_v35 }
  0x4f   :  { %340 = vmatpush.msrb.mxu0 %v146_v36  ;;  %360 = vmatpush.msrb.mxu1 %v147_v37 }
  0x50   :  { %380 = vmatpush.msrb.mxu2 %v148_v38  ;;  %400 = vmatpush.msrb.mxu3 %v149_v39 }
  0x51   :  { %341 = vmatpush.msrb.mxu0 %v142_v40  ;;  %361 = vmatpush.msrb.mxu1 %v143_v41 }
  0x52   :  { %381 = vmatpush.msrb.mxu2 %v144_v42  ;;  %401 = vmatpush.msrb.mxu3 %v145_v43 }
  0x53   :  { %342 = vmatpush.msrb.mxu0 %v138_v44  ;;  %362 = vmatpush.msrb.mxu1 %v139_v45 }
  0x54   :  { %382 = vmatpush.msrb.mxu2 %v140_v46  ;;  %402 = vmatpush.msrb.mxu3 %v141_v47 }
  0x55   :  { %267 = vmatmul.f32.vlgmr.msra.gmra.mxu0 %v117_v48  ;;  %287 = vmatmul.f32.vlgmr.msra.gmra.mxu1 %v117_v48 }
  0x56   :  { %307 = vmatmul.f32.vlgmr.msra.gmra.mxu2 %v117_v48  ;;  %327 = vmatmul.f32.vlgmr.msra.gmra.mxu3 %v117_v48 }
  0x57   :  { %343 = vmatpush.msrb.mxu0 %v134_v49  ;;  %363 = vmatpush.msrb.mxu1 %v135_v50 }
  0x58   :  { %383 = vmatpush.msrb.mxu2 %v136_v51  ;;  %403 = vmatpush.msrb.mxu3 %v137_v52 }
  0x59   :  { %344 = vmatpush.msrb.mxu0 %v130_v53  ;;  %364 = vmatpush.msrb.mxu1 %v131_v54 }
  0x5a   :  { %384 = vmatpush.msrb.mxu2 %v132_v55  ;;  %404 = vmatpush.msrb.mxu3 %v133_v56 }
  0x5b   :  { %345 = vmatpush.msrb.mxu0 %v126_v57  ;;  %365 = vmatpush.msrb.mxu1 %v127_v58 }
  0x5c   :  { %385 = vmatpush.msrb.mxu2 %v128_v59  ;;  %405 = vmatpush.msrb.mxu3 %v129_v60 }
  0x5d   :  { %346 = vmatpush.msrb.mxu0 %v122_v61  ;;  %366 = vmatpush.msrb.mxu1 %v123_v62 }
  0x5e   :  { %386 = vmatpush.msrb.mxu2 %v124_v63  ;;  %406 = vmatpush.msrb.mxu3 %v125_v0 }
  0x5f   :  { %347 = vmatmul.f32.vlgmr.msrb.gmra.mxu0 %v121_v1  ;;  %367 = vmatmul.f32.vlgmr.msrb.gmra.mxu1 %v121_v1 }
  0x60   :  { %387 = vmatmul.f32.vlgmr.msrb.gmra.mxu2 %v121_v1  ;;  %407 = vmatmul.f32.vlgmr.msrb.gmra.mxu3 %v121_v1 }
  0xd2   :  { %v268_v2 = vpop.f32.mrf.mxu0  ;;  %v288_v3 = vpop.f32.mrf.mxu1 }
  0xd9   :  { %v308_v5 = vpop.f32.mrf.mxu2  ;;  %v328_v6 = vpop.f32.mrf.mxu3 }
  0xdc   :  { %v348_v9 = vpop.f32.mrf.mxu0  ;;  %v368_v10 = vpop.f32.mrf.mxu1 }
  0xdd   :  { %v349_v11 = vadd.f32 %v348_v9, %v268_v2  ;;  %v369_v12 = vadd.f32 %v368_v10, %v288_v3 }
  0xdf   :  { %v421_v13 = vadd.f32 %v413_v7, %v349_v11  ;;  %v422_v14 = vadd.f32 %v414_v8, %v369_v12 }
  0xe1   :  { %v425_v15 = vmul.f32 0.5, %v421_v13  ;;  %v429_v16 = vmul.f32 0.5, %v422_v14 }
  0xe3   :  { %494 = vtanh.f32 %v425_v15  ;;  %v388_v19 = vpop.f32.mrf.mxu2  ;;  %v408_v20 = vpop.f32.mrf.mxu3 }
  0xe4   :  { %496 = vtanh.f32 %v429_v16  ;;  %v389_v21 = vadd.f32 %v388_v19, %v308_v5  ;;  %v409_v22 = vadd.f32 %v408_v20, %v328_v6 }
  0xe6   :  { %v423_v23 = vadd.f32 %v415_v17, %v389_v21  ;;  %v424_v24 = vadd.f32 %v416_v18, %v409_v22 }
  0xe8   :  { %498 = vtanh.f32 %v423_v23  ;;  %v434_v25 = vmul.f32 0.5, %v424_v24 }
  0xe9   :  { %v495_v26 = vpop.eup %494 }
  0xea   :  { %v497_v27 = vpop.eup %496  ;;  %v427_v28 = vmul.f32 0.5, %v495_v26  ;;  %500 = vtanh.f32 %v434_v25 }
  0xeb   :  { %v431_v29 = vmul.f32 0.5, %v497_v27 }
  0xec   :  { %v428_v30 = vadd.f32 0.5, %v427_v28 }
  0xed   :  { %v432_v32 = vadd.f32 0.5, %v431_v29 }
  0xee   :  { %v499_v33 = vpop.eup %498 }
  0xef   :  { %v439_v34 = vmul.f32 %v432_v32, %v119_v31  ;;  %v440_v35 = vmul.f32 %v499_v33, %v428_v30 }
  0xf0   :  { %v501_v36 = vpop.eup %500 }
  0xf1   :  { %v441_v37 = vadd.f32 %v440_v35, %v439_v34  ;;  %v436_v38 = vmul.f32 0.5, %v501_v36 }
  0xf3   :  { %447 = vst [vmem:[#allocation16] sm:$0xff] %v441_v37  ;;  %502 = vtanh.f32 %v441_v37  ;;  %v437_v39 = vadd.f32 0.5, %v436_v38 }
  0xf4   :  { %469 = dma.vmem_to_hbm [thread:$0]  %s465_s5, 128, %s467_s8, [#allocation17]  }
  0xf9   :  { %v503_v40 = vpop.eup %502 }
  0xfa   :  { %v443_v41 = vmul.f32 %v503_v40, %v437_v39 }
  0xfc   :  { %446 = vst [vmem:[#allocation15] sm:$0xff] %v443_v41 }
  0xfd   :  { %458 = dma.vmem_to_hbm [thread:$0]  %s454_s10, 128, %s456_s13, [#allocation6]  }
  0xfe   :  { %704 = dma.done.wait [#allocation6], 128  }
  0xff   :  { %705 = vsyncadd [#allocation6], 4294967168 }
 0x100   :  { %706 = dma.done.wait [#allocation17], 128  }
 0x101   :  { %707 = vsyncadd [#allocation17], 4294967168 }
 0x102   :  { %478 = vsyncpa [#allocation5], 1 }
 0x103   :  { %479 = vsyncpa [#allocation8], 1 }
 0x104   :  { %480 = vsyncpa [#allocation11], 1 }
 0x105   :  { %481 = vsyncpa [#allocation14], 1 }
 0x106   :  { %482 = vsyncpa [#allocation6], 1 }
 0x107   :  { %483 = vsyncpa [#allocation17], 1 }

</bundles_post_ra>
